<compile_context>
chip_gen: v6e
topology: v6e:2x2x1
jax: 0.10.0
libtpu: 0.0.40
codegen_flags: <defaults>
</compile_context>

<pallas_src>
import functools

import jax
import jax.numpy as jnp
from jax import lax
from jax.experimental import pallas as pl
from jax.experimental.pallas import tpu as pltpu


def _mha_fused_kernel(xq_ref, xkv_ref, wqkv_ref, wproj_ref, bproj_ref,
                      o_ref, k_scr, v_scr, *,
                      num_heads, head_size, q_tile, attn_dtype):
    """Fused causal MHA + output projection for one (batch, query-tile) step.

    xq_ref    : (1, tq, C)  query rows of this tile
    xkv_ref   : (1, T,  C)  full row (only read when qi == 0)
    wqkv_ref  : (C, 3C)     packed [Wq*D^-0.5 | Wk | Wv], (in, out) layout
    wproj_ref : (C, C)      output projection, (in, out) layout
    bproj_ref : (1, C)      output projection bias
    o_ref     : (1, tq, C)  lane-dense output tile
    k_scr     : (H, T, D)   per-head K, persists across query tiles of a row
    v_scr     : (H, T, D)   per-head V, persists across query tiles of a row
    """
    H, D = num_heads, head_size
    C = H * D
    T = xkv_ref.shape[1]
    tq = q_tile
    qi = pl.program_id(1)

    # ---- K/V projection for the whole row, once per batch row (qi == 0) ----
    @pl.when(qi == 0)
    def _():
        x_full = xkv_ref[0]                                        # (T, C)
        kv = jnp.dot(x_full, wqkv_ref[:, C:],                      # (T, 2C)
                     preferred_element_type=jnp.float32).astype(attn_dtype)
        for h in range(H):                                         # cheap slice-stores
            k_scr[h] = kv[:, h * D:(h + 1) * D]
            v_scr[h] = kv[:, C + h * D:C + (h + 1) * D]

    # ---- Q projection for this query tile (scale already folded into Wq) ---
    xq = xq_ref[0]                                                 # (tq, C)
    q_all = jnp.dot(xq, wqkv_ref[:, :C],
                    preferred_element_type=jnp.float32).astype(attn_dtype)
    q = jnp.stack([q_all[:, h * D:(h + 1) * D] for h in range(H)], axis=0)  # (H,tq,D)

    k = k_scr[...]                                                 # (H, T, D) bf16
    v = v_scr[...]

    # ---- causal scores + softmax (f32 math), batched over heads ------------
    s = jnp.einsum('hqd,hkd->hqk', q, k,
                   preferred_element_type=jnp.float32)             # (H, tq, T)
    q0 = qi * tq
    rows = lax.broadcasted_iota(jnp.int32, (tq, T), 0) + q0
    cols = lax.broadcasted_iota(jnp.int32, (tq, T), 1)
    causal = (rows >= cols)[None, :, :]
    s = jnp.where(causal, s, -jnp.inf)                             # diag never masked
    s = s - jnp.max(s, axis=-1, keepdims=True)
    p = jnp.exp(s)
    p = p / jnp.sum(p, axis=-1, keepdims=True)                     # exact division

    att = jnp.einsum('hqk,hkd->hqd', p.astype(attn_dtype), v,
                     preferred_element_type=jnp.float32)           # (H, tq, D)
    att = jnp.concatenate([att[h] for h in range(H)], axis=-1)     # (tq, C)

    # ---- fused output projection (+ bias); dropout p=0.0 -> identity -------
    y = jnp.dot(att.astype(wproj_ref.dtype), wproj_ref[...],
                preferred_element_type=jnp.float32)
    y = y + bproj_ref[...].astype(jnp.float32)
    o_ref[0] = y.astype(o_ref.dtype)


def _pick_q_tile(T):
    for cand in (256, 128, 64, 32, 16, 8):
        if T % cand == 0:
            return cand
    return T


def multi_head_attention(x, wk, wq, wv, w_proj, b_proj,
                         attn_dtype=jnp.bfloat16):
    """
    x        : (B, T, C)
    wk/wq/wv : (H, C, D)   stacked per-head weights, (in, out) layout
    w_proj   : (C, C)      (in, out) layout
    b_proj   : (1, C)
    returns  : (B, T, C)
    """
    B, T, C = x.shape
    H, _, D = wq.shape
    assert H * D == C

    def stack(w):  # (H, C, D) -> (C, H*D); head h occupies columns [h*D:(h+1)*D]
        return jnp.transpose(w, (1, 0, 2)).reshape(C, H * D)

    scale = jnp.asarray(D, jnp.float32) ** -0.5
    # Fold 1/sqrt(D) into the Q columns; columns = [Q | K | V] (all heads each).
    wqkv = jnp.concatenate([stack(wq) * scale, stack(wk), stack(wv)],
                           axis=1).astype(x.dtype)
    w_proj = w_proj.astype(x.dtype)
    b_proj = b_proj.astype(x.dtype)

    tq = _pick_q_tile(T)
    nq = T // tq

    kernel = functools.partial(_mha_fused_kernel, num_heads=H, head_size=D,
                               q_tile=tq, attn_dtype=attn_dtype)

    def build(weight_pipeline_mode):
        wkw = ({} if weight_pipeline_mode is None
               else dict(pipeline_mode=weight_pipeline_mode))
        return pl.pallas_call(
            kernel,
            out_shape=jax.ShapeDtypeStruct((B, T, C), x.dtype),
            grid_spec=pltpu.PrefetchScalarGridSpec(
                num_scalar_prefetch=0,
                grid=(B, nq),
                in_specs=[
                    # query tile of x
                    pl.BlockSpec((1, tq, C), lambda b, qi: (b, qi, 0)),
                    # full row of x for K/V (constant over qi -> fetched once/row)
                    pl.BlockSpec((1, T, C), lambda b, qi: (b, 0, 0)),
                    # weights: constant index maps -> VMEM-resident; single-buffered
                    pl.BlockSpec((C, 3 * C), lambda b, qi: (0, 0), **wkw),
                    pl.BlockSpec((C, C), lambda b, qi: (0, 0), **wkw),
                    pl.BlockSpec((1, C), lambda b, qi: (0, 0), **wkw),
                ],
                out_specs=pl.BlockSpec((1, tq, C), lambda b, qi: (b, qi, 0)),
                scratch_shapes=[
                    pltpu.VMEM((H, T, D), attn_dtype),   # K (per-head layout)
                    pltpu.VMEM((H, T, D), attn_dtype),   # V (per-head layout)
                ],
            ),
            compiler_params=pltpu.CompilerParams(
                # batch axis feeds both TensorCores; query-tile axis is
                # "arbitrary" because K/V scratch is carried across it.
                dimension_semantics=("parallel", "arbitrary"),
                vmem_limit_bytes=64 * 1024 * 1024,
            ),
        )

    args = (x, x, wqkv, w_proj, b_proj)
    try:
        return build(pl.Buffered(1))(*args)
    except Exception:
        # Fallback if this jaxlib rejects single-buffered BlockSpecs.
        return build(None)(*args)


def _reference(x, wk, wq, wv, w_proj, b_proj):
    """Pure-JAX reference mirroring the PyTorch forward (f32)."""
    B, T, C = x.shape
    H, _, D = wq.shape
    scale = D ** -0.5
    tril = jnp.tril(jnp.ones((T, T), dtype=bool))
    outs = []
    for h in range(H):
        k = x @ wk[h]
        q = x @ wq[h]
        v = x @ wv[h]
        wei = (q @ jnp.swapaxes(k, -2, -1)) * scale
        wei = jnp.where(tril, wei, -jnp.inf)
        wei = jax.nn.softmax(wei, axis=-1)
        outs.append(wei @ v)
    cat = jnp.concatenate(outs, axis=-1)
    return cat @ w_proj + b_proj[0]


if __name__ == "__main__":
    # small, module-consistent shapes
    B, T = 2, 8               # batch, block_size (sequence length)
    n_embd = 32
    num_heads = 4
    head_size = n_embd // num_heads   # 8

    key = jax.random.PRNGKey(0)
    kx, kk, kq, kv, kw, kb = jax.random.split(key, 6)

    x = jax.random.normal(kx, (B, T, n_embd), dtype=jnp.float32)

    # deterministic parameter init (nn.Linear-like scale)
    std = n_embd ** -0.5
    wk = jax.random.normal(kk, (num_heads, n_embd, head_size), jnp.float32) * std
    wq = jax.random.normal(kq, (num_heads, n_embd, head_size), jnp.float32) * std
    wv = jax.random.normal(kv, (num_heads, n_embd, head_size), jnp.float32) * std
    w_proj = jax.random.normal(kw, (n_embd, n_embd), jnp.float32) * std
    b_proj = (jax.random.normal(kb, (1, n_embd), jnp.float32) * std)

    out = multi_head_attention(x, wk, wq, wv, w_proj, b_proj)
    out = jax.block_until_ready(out)

    ref = _reference(x, wk, wq, wv, w_proj, b_proj)
    assert out.shape == (B, T, n_embd)
    # Tolerance accounts for the bf16 MXU operands (q/k/v/p) recommended by the
    # perf review; softmax itself is exact f32 (no approx reciprocal anymore).
    assert jnp.allclose(out, ref, atol=5e-2, rtol=5e-2)

    print("KERNEL_OK")
</pallas_src>

<mosaic_0001>
module attributes {stable_mosaic.version = 11 : i64} {
  func.func @_mha_fused_kernel(%arg0: i32, %arg1: i32, %arg2: memref<1x8x32xf32, #tpu.memory_space<vmem>>, %arg3: memref<1x8x32xf32, #tpu.memory_space<vmem>>, %arg4: memref<32x96xf32, #tpu.memory_space<vmem>>, %arg5: memref<32x32xf32, #tpu.memory_space<vmem>>, %arg6: memref<1x32xf32, #tpu.memory_space<vmem>>, %arg7: memref<1x8x32xf32, #tpu.memory_space<vmem>>, %arg8: memref<4x8x8xbf16, #tpu.memory_space<vmem>>, %arg9: memref<4x8x8xbf16, #tpu.memory_space<vmem>>) attributes {dimension_semantics = [#tpu.dimension_semantics<parallel>, #tpu.dimension_semantics<arbitrary>], iteration_bounds = array<i64: 2, 1>, scalar_prefetch = 0 : i64, scratch_operands = 2 : i64, tpu.core_type = #tpu.core_type<tc>, window_params = [{transform_indices = @transform_0, window_bounds = array<i64: 1, 8, 32>}, {transform_indices = @transform_1, window_bounds = array<i64: 1, 8, 32>}, {pipeline_mode = #tpu.pipeline_mode<synchronous>, transform_indices = @transform_2, window_bounds = array<i64: 32, 96>}, {pipeline_mode = #tpu.pipeline_mode<synchronous>, transform_indices = @transform_3, window_bounds = array<i64: 32, 32>}, {pipeline_mode = #tpu.pipeline_mode<synchronous>, transform_indices = @transform_4, window_bounds = array<i64: 1, 32>}, {transform_indices = @transform_5, window_bounds = array<i64: 1, 8, 32>}]} {
    %c0_i32 = arith.constant 0 : i32
    %0 = arith.cmpi eq, %arg1, %c0_i32 : i32
    %1 = arith.extui %0 : i1 to i32
    %c0_i32_0 = arith.constant 0 : i32
    %2 = arith.cmpi ne, %1, %c0_i32_0 : i32
    scf.if %2 {
      %c0_24 = arith.constant 0 : index
      %c0_25 = arith.constant 0 : index
      %c0_26 = arith.constant 0 : index
      %59 = vector.load %arg3[%c0_24, %c0_25, %c0_26] : memref<1x8x32xf32, #tpu.memory_space<vmem>>, vector<1x8x32xf32>
      %60 = vector.shape_cast %59 : vector<1x8x32xf32> to vector<8x32xf32>
      %c0_27 = arith.constant 0 : index
      %c32 = arith.constant 32 : index
      %61 = vector.load %arg4[%c0_27, %c32] : memref<32x96xf32, #tpu.memory_space<vmem>>, vector<32x64xf32>
      %cst_28 = arith.constant dense<0.000000e+00> : vector<8x64xf32>
      %62 = tpu.matmul %60, %61, %cst_28 {dimension_numbers = #tpu.dot_dimension_numbers<[1], [0], [0], [1], [0, 0, 1, 1], [], []>} : vector<8x32xf32>, vector<32x64xf32>, vector<8x64xf32> -> vector<8x64xf32>
      %63 = arith.truncf %62 : vector<8x64xf32> to vector<8x64xbf16>
      %64 = vector.extract_strided_slice %63 {offsets = [0, 0], sizes = [8, 8], strides = [1, 1]} : vector<8x64xbf16> to vector<8x8xbf16>
      %c0_29 = arith.constant 0 : index
      %c0_30 = arith.constant 0 : index
      %c0_31 = arith.constant 0 : index
      %65 = vector.load %arg8[%c0_29, %c0_30, %c0_31] : memref<4x8x8xbf16, #tpu.memory_space<vmem>>, vector<1x8x8xbf16>
      %66 = vector.shape_cast %65 : vector<1x8x8xbf16> to vector<8x8xbf16>
      %67 = vector.shape_cast %64 : vector<8x8xbf16> to vector<1x8x8xbf16>
      tpu.vector_store %arg8[%c0_29, %c0_30, %c0_31], %67 {strides = array<i32>} : memref<4x8x8xbf16, #tpu.memory_space<vmem>>, vector<1x8x8xbf16>,
      %68 = vector.extract_strided_slice %63 {offsets = [0, 32], sizes = [8, 8], strides = [1, 1]} : vector<8x64xbf16> to vector<8x8xbf16>
      %c0_32 = arith.constant 0 : index
      %c0_33 = arith.constant 0 : index
      %c0_34 = arith.constant 0 : index
      %69 = vector.load %arg9[%c0_32, %c0_33, %c0_34] : memref<4x8x8xbf16, #tpu.memory_space<vmem>>, vector<1x8x8xbf16>
      %70 = vector.shape_cast %69 : vector<1x8x8xbf16> to vector<8x8xbf16>
      %71 = vector.shape_cast %68 : vector<8x8xbf16> to vector<1x8x8xbf16>
      tpu.vector_store %arg9[%c0_32, %c0_33, %c0_34], %71 {strides = array<i32>} : memref<4x8x8xbf16, #tpu.memory_space<vmem>>, vector<1x8x8xbf16>,
      %72 = vector.extract_strided_slice %63 {offsets = [0, 8], sizes = [8, 8], strides = [1, 1]} : vector<8x64xbf16> to vector<8x8xbf16>
      %c1 = arith.constant 1 : index
      %c0_35 = arith.constant 0 : index
      %c0_36 = arith.constant 0 : index
      %73 = vector.load %arg8[%c1, %c0_35, %c0_36] : memref<4x8x8xbf16, #tpu.memory_space<vmem>>, vector<1x8x8xbf16>
      %74 = vector.shape_cast %73 : vector<1x8x8xbf16> to vector<8x8xbf16>
      %75 = vector.shape_cast %72 : vector<8x8xbf16> to vector<1x8x8xbf16>
      tpu.vector_store %arg8[%c1, %c0_35, %c0_36], %75 {strides = array<i32>} : memref<4x8x8xbf16, #tpu.memory_space<vmem>>, vector<1x8x8xbf16>,
      %76 = vector.extract_strided_slice %63 {offsets = [0, 40], sizes = [8, 8], strides = [1, 1]} : vector<8x64xbf16> to vector<8x8xbf16>
      %c1_37 = arith.constant 1 : index
      %c0_38 = arith.constant 0 : index
      %c0_39 = arith.constant 0 : index
      %77 = vector.load %arg9[%c1_37, %c0_38, %c0_39] : memref<4x8x8xbf16, #tpu.memory_space<vmem>>, vector<1x8x8xbf16>
      %78 = vector.shape_cast %77 : vector<1x8x8xbf16> to vector<8x8xbf16>
      %79 = vector.shape_cast %76 : vector<8x8xbf16> to vector<1x8x8xbf16>
      tpu.vector_store %arg9[%c1_37, %c0_38, %c0_39], %79 {strides = array<i32>} : memref<4x8x8xbf16, #tpu.memory_space<vmem>>, vector<1x8x8xbf16>,
      %80 = vector.extract_strided_slice %63 {offsets = [0, 16], sizes = [8, 8], strides = [1, 1]} : vector<8x64xbf16> to vector<8x8xbf16>
      %c2 = arith.constant 2 : index
      %c0_40 = arith.constant 0 : index
      %c0_41 = arith.constant 0 : index
      %81 = vector.load %arg8[%c2, %c0_40, %c0_41] : memref<4x8x8xbf16, #tpu.memory_space<vmem>>, vector<1x8x8xbf16>
      %82 = vector.shape_cast %81 : vector<1x8x8xbf16> to vector<8x8xbf16>
      %83 = vector.shape_cast %80 : vector<8x8xbf16> to vector<1x8x8xbf16>
      tpu.vector_store %arg8[%c2, %c0_40, %c0_41], %83 {strides = array<i32>} : memref<4x8x8xbf16, #tpu.memory_space<vmem>>, vector<1x8x8xbf16>,
      %84 = vector.extract_strided_slice %63 {offsets = [0, 48], sizes = [8, 8], strides = [1, 1]} : vector<8x64xbf16> to vector<8x8xbf16>
      %c2_42 = arith.constant 2 : index
      %c0_43 = arith.constant 0 : index
      %c0_44 = arith.constant 0 : index
      %85 = vector.load %arg9[%c2_42, %c0_43, %c0_44] : memref<4x8x8xbf16, #tpu.memory_space<vmem>>, vector<1x8x8xbf16>
      %86 = vector.shape_cast %85 : vector<1x8x8xbf16> to vector<8x8xbf16>
      %87 = vector.shape_cast %84 : vector<8x8xbf16> to vector<1x8x8xbf16>
      tpu.vector_store %arg9[%c2_42, %c0_43, %c0_44], %87 {strides = array<i32>} : memref<4x8x8xbf16, #tpu.memory_space<vmem>>, vector<1x8x8xbf16>,
      %88 = vector.extract_strided_slice %63 {offsets = [0, 24], sizes = [8, 8], strides = [1, 1]} : vector<8x64xbf16> to vector<8x8xbf16>
      %c3 = arith.constant 3 : index
      %c0_45 = arith.constant 0 : index
      %c0_46 = arith.constant 0 : index
      %89 = vector.load %arg8[%c3, %c0_45, %c0_46] : memref<4x8x8xbf16, #tpu.memory_space<vmem>>, vector<1x8x8xbf16>
      %90 = vector.shape_cast %89 : vector<1x8x8xbf16> to vector<8x8xbf16>
      %91 = vector.shape_cast %88 : vector<8x8xbf16> to vector<1x8x8xbf16>
      tpu.vector_store %arg8[%c3, %c0_45, %c0_46], %91 {strides = array<i32>} : memref<4x8x8xbf16, #tpu.memory_space<vmem>>, vector<1x8x8xbf16>,
      %92 = vector.extract_strided_slice %63 {offsets = [0, 56], sizes = [8, 8], strides = [1, 1]} : vector<8x64xbf16> to vector<8x8xbf16>
      %c3_47 = arith.constant 3 : index
      %c0_48 = arith.constant 0 : index
      %c0_49 = arith.constant 0 : index
      %93 = vector.load %arg9[%c3_47, %c0_48, %c0_49] : memref<4x8x8xbf16, #tpu.memory_space<vmem>>, vector<1x8x8xbf16>
      %94 = vector.shape_cast %93 : vector<1x8x8xbf16> to vector<8x8xbf16>
      %95 = vector.shape_cast %92 : vector<8x8xbf16> to vector<1x8x8xbf16>
      tpu.vector_store %arg9[%c3_47, %c0_48, %c0_49], %95 {strides = array<i32>} : memref<4x8x8xbf16, #tpu.memory_space<vmem>>, vector<1x8x8xbf16>,
    } else {
    }
    %c0 = arith.constant 0 : index
    %c0_1 = arith.constant 0 : index
    %c0_2 = arith.constant 0 : index
    %3 = vector.load %arg2[%c0, %c0_1, %c0_2] : memref<1x8x32xf32, #tpu.memory_space<vmem>>, vector<1x8x32xf32>
    %4 = vector.shape_cast %3 : vector<1x8x32xf32> to vector<8x32xf32>
    %c0_3 = arith.constant 0 : index
    %c0_4 = arith.constant 0 : index
    %5 = vector.load %arg4[%c0_3, %c0_4] : memref<32x96xf32, #tpu.memory_space<vmem>>, vector<32x32xf32>
    %cst = arith.constant dense<0.000000e+00> : vector<8x32xf32>
    %6 = tpu.matmul %4, %5, %cst {dimension_numbers = #tpu.dot_dimension_numbers<[1], [0], [0], [1], [0, 0, 1, 1], [], []>} : vector<8x32xf32>, vector<32x32xf32>, vector<8x32xf32> -> vector<8x32xf32>
    %7 = arith.truncf %6 : vector<8x32xf32> to vector<8x32xbf16>
    %8 = vector.extract_strided_slice %7 {offsets = [0, 0], sizes = [8, 8], strides = [1, 1]} : vector<8x32xbf16> to vector<8x8xbf16>
    %9 = vector.extract_strided_slice %7 {offsets = [0, 8], sizes = [8, 8], strides = [1, 1]} : vector<8x32xbf16> to vector<8x8xbf16>
    %10 = vector.extract_strided_slice %7 {offsets = [0, 16], sizes = [8, 8], strides = [1, 1]} : vector<8x32xbf16> to vector<8x8xbf16>
    %11 = vector.extract_strided_slice %7 {offsets = [0, 24], sizes = [8, 8], strides = [1, 1]} : vector<8x32xbf16> to vector<8x8xbf16>
    %12 = vector.shape_cast %8 : vector<8x8xbf16> to vector<1x8x8xbf16>
    %13 = vector.shape_cast %9 : vector<8x8xbf16> to vector<1x8x8xbf16>
    %14 = vector.shape_cast %10 : vector<8x8xbf16> to vector<1x8x8xbf16>
    %15 = vector.shape_cast %11 : vector<8x8xbf16> to vector<1x8x8xbf16>
    %16 = tpu.concatenate %12, %13, %14, %15 in 0 : vector<1x8x8xbf16>, vector<1x8x8xbf16>, vector<1x8x8xbf16>, vector<1x8x8xbf16> -> vector<4x8x8xbf16>
    %c0_5 = arith.constant 0 : index
    %c0_6 = arith.constant 0 : index
    %c0_7 = arith.constant 0 : index
    %17 = vector.load %arg8[%c0_5, %c0_6, %c0_7] : memref<4x8x8xbf16, #tpu.memory_space<vmem>>, vector<4x8x8xbf16>
    %c0_8 = arith.constant 0 : index
    %c0_9 = arith.constant 0 : index
    %c0_10 = arith.constant 0 : index
    %18 = vector.load %arg9[%c0_8, %c0_9, %c0_10] : memref<4x8x8xbf16, #tpu.memory_space<vmem>>, vector<4x8x8xbf16>
    "tpu.trace_start"() <{level = 10 : i32, message = "hqd,hkd->hqk"}> : () -> ()
    %cst_11 = arith.constant dense<0.000000e+00> : vector<4x8x8xf32>
    %19 = tpu.matmul %16, %17, %cst_11 {dimension_numbers = #tpu.dot_dimension_numbers<[2], [2], [1], [1], [0, 0, 0, 1, 1, 1], [0], [0]>} : vector<4x8x8xbf16>, vector<4x8x8xbf16>, vector<4x8x8xf32> -> vector<4x8x8xf32>
    "tpu.trace_stop"() : () -> ()
    %c8_i32 = arith.constant 8 : i32
    %20 = arith.muli %arg1, %c8_i32 : i32
    %21 = tpu.iota {dimensions = array<i32: 0>} : vector<8x8xi32>
    %22 = vector.broadcast %20 : i32 to vector<8x8xi32>
    %23 = arith.addi %21, %22 : vector<8x8xi32>
    %24 = tpu.iota {dimensions = array<i32: 1>} : vector<8x8xi32>
    %25 = arith.cmpi sge, %23, %24 : vector<8x8xi32>
    %26 = vector.shape_cast %25 : vector<8x8xi1> to vector<1x8x8xi1>
    %cst_12 = arith.constant 0xFF800000 : f32
    %27 = vector.shape_cast %26 : vector<1x8x8xi1> to vector<1x8x8xi1>
    %28 = vector.broadcast %27 : vector<1x8x8xi1> to vector<4x8x8xi1>
    %29 = vector.broadcast %cst_12 : f32 to vector<4x8x8xf32>
    %30 = arith.select %28, %19, %29 : vector<4x8x8xi1>, vector<4x8x8xf32>
    %cst_13 = arith.constant dense<0xFF800000> : vector<4x8xf32>
    %31 = vector.multi_reduction <maximumf>, %30, %cst_13 [2] : vector<4x8x8xf32> to vector<4x8xf32>
    %32 = vector.shape_cast %31 : vector<4x8xf32> to vector<4x8x1xf32>
    %33 = vector.broadcast %32 : vector<4x8x1xf32> to vector<4x8x8xf32>
    %34 = arith.subf %30, %33 : vector<4x8x8xf32>
    %35 = math.exp %34 : vector<4x8x8xf32>
    %cst_14 = arith.constant dense<0.000000e+00> : vector<4x8xf32>
    %36 = vector.multi_reduction <add>, %35, %cst_14 [2] : vector<4x8x8xf32> to vector<4x8xf32>
    %37 = vector.shape_cast %36 : vector<4x8xf32> to vector<4x8x1xf32>
    %38 = vector.broadcast %37 : vector<4x8x1xf32> to vector<4x8x8xf32>
    %39 = arith.divf %35, %38 : vector<4x8x8xf32>
    %40 = arith.truncf %39 : vector<4x8x8xf32> to vector<4x8x8xbf16>
    "tpu.trace_start"() <{level = 10 : i32, message = "hqk,hkd->hqd"}> : () -> ()
    %cst_15 = arith.constant dense<0.000000e+00> : vector<4x8x8xf32>
    %41 = tpu.matmul %40, %18, %cst_15 {dimension_numbers = #tpu.dot_dimension_numbers<[2], [1], [1], [2], [0, 0, 0, 1, 1, 2], [0], [0]>} : vector<4x8x8xbf16>, vector<4x8x8xbf16>, vector<4x8x8xf32> -> vector<4x8x8xf32>
    "tpu.trace_stop"() : () -> ()
    %42 = vector.extract_strided_slice %41 {offsets = [0, 0, 0], sizes = [1, 8, 8], strides = [1, 1, 1]} : vector<4x8x8xf32> to vector<1x8x8xf32>
    %43 = vector.shape_cast %42 : vector<1x8x8xf32> to vector<8x8xf32>
    %44 = vector.extract_strided_slice %41 {offsets = [1, 0, 0], sizes = [1, 8, 8], strides = [1, 1, 1]} : vector<4x8x8xf32> to vector<1x8x8xf32>
    %45 = vector.shape_cast %44 : vector<1x8x8xf32> to vector<8x8xf32>
    %46 = vector.extract_strided_slice %41 {offsets = [2, 0, 0], sizes = [1, 8, 8], strides = [1, 1, 1]} : vector<4x8x8xf32> to vector<1x8x8xf32>
    %47 = vector.shape_cast %46 : vector<1x8x8xf32> to vector<8x8xf32>
    %48 = vector.extract_strided_slice %41 {offsets = [3, 0, 0], sizes = [1, 8, 8], strides = [1, 1, 1]} : vector<4x8x8xf32> to vector<1x8x8xf32>
    %49 = vector.shape_cast %48 : vector<1x8x8xf32> to vector<8x8xf32>
    %50 = tpu.concatenate %43, %45, %47, %49 in 1 : vector<8x8xf32>, vector<8x8xf32>, vector<8x8xf32>, vector<8x8xf32> -> vector<8x32xf32>
    %c0_16 = arith.constant 0 : index
    %c0_17 = arith.constant 0 : index
    %51 = vector.load %arg5[%c0_16, %c0_17] : memref<32x32xf32, #tpu.memory_space<vmem>>, vector<32x32xf32>
    %cst_18 = arith.constant dense<0.000000e+00> : vector<8x32xf32>
    %52 = tpu.matmul %50, %51, %cst_18 {dimension_numbers = #tpu.dot_dimension_numbers<[1], [0], [0], [1], [0, 0, 1, 1], [], []>} : vector<8x32xf32>, vector<32x32xf32>, vector<8x32xf32> -> vector<8x32xf32>
    %c0_19 = arith.constant 0 : index
    %c0_20 = arith.constant 0 : index
    %53 = vector.load %arg6[%c0_19, %c0_20] : memref<1x32xf32, #tpu.memory_space<vmem>>, vector<1x32xf32>
    %54 = vector.broadcast %53 : vector<1x32xf32> to vector<8x32xf32>
    %55 = arith.addf %52, %54 : vector<8x32xf32>
    %c0_21 = arith.constant 0 : index
    %c0_22 = arith.constant 0 : index
    %c0_23 = arith.constant 0 : index
    %56 = vector.load %arg7[%c0_21, %c0_22, %c0_23] : memref<1x8x32xf32, #tpu.memory_space<vmem>>, vector<1x8x32xf32>
    %57 = vector.shape_cast %56 : vector<1x8x32xf32> to vector<8x32xf32>
    %58 = vector.shape_cast %55 : vector<8x32xf32> to vector<1x8x32xf32>
    tpu.vector_store %arg7[%c0_21, %c0_22, %c0_23], %58 {strides = array<i32>} : memref<1x8x32xf32, #tpu.memory_space<vmem>>, vector<1x8x32xf32>,
    return
  }
  func.func @transform_0(%arg0: i32, %arg1: i32) -> (i32, i32, i32) {
    %c0_i32 = arith.constant 0 : i32
    %c0_i32_0 = arith.constant 0 : i32
    return %arg0, %arg1, %c0_i32 : i32, i32, i32
  }
  func.func @transform_1(%arg0: i32, %arg1: i32) -> (i32, i32, i32) {
    %c0_i32 = arith.constant 0 : i32
    %c0_i32_0 = arith.constant 0 : i32
    %c0_i32_1 = arith.constant 0 : i32
    return %arg0, %c0_i32, %c0_i32_0 : i32, i32, i32
  }
  func.func @transform_2(%arg0: i32, %arg1: i32) -> (i32, i32) {
    %c0_i32 = arith.constant 0 : i32
    %c0_i32_0 = arith.constant 0 : i32
    %c0_i32_1 = arith.constant 0 : i32
    return %c0_i32, %c0_i32_0 : i32, i32
  }
  func.func @transform_3(%arg0: i32, %arg1: i32) -> (i32, i32) {
    %c0_i32 = arith.constant 0 : i32
    %c0_i32_0 = arith.constant 0 : i32
    %c0_i32_1 = arith.constant 0 : i32
    return %c0_i32, %c0_i32_0 : i32, i32
  }
  func.func @transform_4(%arg0: i32, %arg1: i32) -> (i32, i32) {
    %c0_i32 = arith.constant 0 : i32
    %c0_i32_0 = arith.constant 0 : i32
    %c0_i32_1 = arith.constant 0 : i32
    return %c0_i32, %c0_i32_0 : i32, i32
  }
  func.func @transform_5(%arg0: i32, %arg1: i32) -> (i32, i32, i32) {
    %c0_i32 = arith.constant 0 : i32
    %c0_i32_0 = arith.constant 0 : i32
    return %arg0, %arg1, %c0_i32 : i32, i32, i32
  }
}

module attributes {stable_mosaic.version = 11 : i64} {
  func.func @_mha_fused_kernel(%arg0: i32, %arg1: i32, %arg2: memref<1x8x32xf32, #tpu.memory_space<vmem>>, %arg3: memref<1x8x32xf32, #tpu.memory_space<vmem>>, %arg4: memref<32x96xf32, #tpu.memory_space<vmem>>, %arg5: memref<32x32xf32, #tpu.memory_space<vmem>>, %arg6: memref<1x32xf32, #tpu.memory_space<vmem>>, %arg7: memref<1x8x32xf32, #tpu.memory_space<vmem>>, %arg8: memref<4x8x8xbf16, #tpu.memory_space<vmem>>, %arg9: memref<4x8x8xbf16, #tpu.memory_space<vmem>>) attributes {dimension_semantics = [#tpu.dimension_semantics<parallel>, #tpu.dimension_semantics<arbitrary>], iteration_bounds = array<i64: 2, 1>, scalar_prefetch = 0 : i64, scratch_operands = 2 : i64, tpu.core_type = #tpu.core_type<tc>, window_params = [{transform_indices = @transform_0, window_bounds = array<i64: 1, 8, 32>}, {transform_indices = @transform_1, window_bounds = array<i64: 1, 8, 32>}, {pipeline_mode = #tpu.pipeline_mode<synchronous>, transform_indices = @transform_2, window_bounds = array<i64: 32, 96>}, {pipeline_mode = #tpu.pipeline_mode<synchronous>, transform_indices = @transform_3, window_bounds = array<i64: 32, 32>}, {pipeline_mode = #tpu.pipeline_mode<synchronous>, transform_indices = @transform_4, window_bounds = array<i64: 1, 32>}, {transform_indices = @transform_5, window_bounds = array<i64: 1, 8, 32>}]} {
    %c0_i32 = arith.constant 0 : i32
    %0 = arith.cmpi eq, %arg1, %c0_i32 : i32
    %1 = arith.extui %0 : i1 to i32
    %c0_i32_0 = arith.constant 0 : i32
    %2 = arith.cmpi ne, %1, %c0_i32_0 : i32
    scf.if %2 {
      %c0_24 = arith.constant 0 : index
      %c0_25 = arith.constant 0 : index
      %c0_26 = arith.constant 0 : index
      %59 = vector.load %arg3[%c0_24, %c0_25, %c0_26] : memref<1x8x32xf32, #tpu.memory_space<vmem>>, vector<1x8x32xf32>
      %60 = vector.shape_cast %59 : vector<1x8x32xf32> to vector<8x32xf32>
      %c0_27 = arith.constant 0 : index
      %c32 = arith.constant 32 : index
      %61 = vector.load %arg4[%c0_27, %c32] : memref<32x96xf32, #tpu.memory_space<vmem>>, vector<32x64xf32>
      %cst_28 = arith.constant dense<0.000000e+00> : vector<8x64xf32>
      %62 = tpu.matmul %60, %61, %cst_28 {dimension_numbers = #tpu.dot_dimension_numbers<[1], [0], [0], [1], [0, 0, 1, 1], [], []>} : vector<8x32xf32>, vector<32x64xf32>, vector<8x64xf32> -> vector<8x64xf32>
      %63 = arith.truncf %62 : vector<8x64xf32> to vector<8x64xbf16>
      %64 = vector.extract_strided_slice %63 {offsets = [0, 0], sizes = [8, 8], strides = [1, 1]} : vector<8x64xbf16> to vector<8x8xbf16>
      %c0_29 = arith.constant 0 : index
      %c0_30 = arith.constant 0 : index
      %c0_31 = arith.constant 0 : index
      %65 = vector.load %arg8[%c0_29, %c0_30, %c0_31] : memref<4x8x8xbf16, #tpu.memory_space<vmem>>, vector<1x8x8xbf16>
      %66 = vector.shape_cast %65 : vector<1x8x8xbf16> to vector<8x8xbf16>
      %67 = vector.shape_cast %64 : vector<8x8xbf16> to vector<1x8x8xbf16>
      tpu.vector_store %arg8[%c0_29, %c0_30, %c0_31], %67 {strides = array<i32>} : memref<4x8x8xbf16, #tpu.memory_space<vmem>>, vector<1x8x8xbf16>,
      %68 = vector.extract_strided_slice %63 {offsets = [0, 32], sizes = [8, 8], strides = [1, 1]} : vector<8x64xbf16> to vector<8x8xbf16>
      %c0_32 = arith.constant 0 : index
      %c0_33 = arith.constant 0 : index
      %c0_34 = arith.constant 0 : index
      %69 = vector.load %arg9[%c0_32, %c0_33, %c0_34] : memref<4x8x8xbf16, #tpu.memory_space<vmem>>, vector<1x8x8xbf16>
      %70 = vector.shape_cast %69 : vector<1x8x8xbf16> to vector<8x8xbf16>
      %71 = vector.shape_cast %68 : vector<8x8xbf16> to vector<1x8x8xbf16>
      tpu.vector_store %arg9[%c0_32, %c0_33, %c0_34], %71 {strides = array<i32>} : memref<4x8x8xbf16, #tpu.memory_space<vmem>>, vector<1x8x8xbf16>,
      %72 = vector.extract_strided_slice %63 {offsets = [0, 8], sizes = [8, 8], strides = [1, 1]} : vector<8x64xbf16> to vector<8x8xbf16>
      %c1 = arith.constant 1 : index
      %c0_35 = arith.constant 0 : index
      %c0_36 = arith.constant 0 : index
      %73 = vector.load %arg8[%c1, %c0_35, %c0_36] : memref<4x8x8xbf16, #tpu.memory_space<vmem>>, vector<1x8x8xbf16>
      %74 = vector.shape_cast %73 : vector<1x8x8xbf16> to vector<8x8xbf16>
      %75 = vector.shape_cast %72 : vector<8x8xbf16> to vector<1x8x8xbf16>
      tpu.vector_store %arg8[%c1, %c0_35, %c0_36], %75 {strides = array<i32>} : memref<4x8x8xbf16, #tpu.memory_space<vmem>>, vector<1x8x8xbf16>,
      %76 = vector.extract_strided_slice %63 {offsets = [0, 40], sizes = [8, 8], strides = [1, 1]} : vector<8x64xbf16> to vector<8x8xbf16>
      %c1_37 = arith.constant 1 : index
      %c0_38 = arith.constant 0 : index
      %c0_39 = arith.constant 0 : index
      %77 = vector.load %arg9[%c1_37, %c0_38, %c0_39] : memref<4x8x8xbf16, #tpu.memory_space<vmem>>, vector<1x8x8xbf16>
      %78 = vector.shape_cast %77 : vector<1x8x8xbf16> to vector<8x8xbf16>
      %79 = vector.shape_cast %76 : vector<8x8xbf16> to vector<1x8x8xbf16>
      tpu.vector_store %arg9[%c1_37, %c0_38, %c0_39], %79 {strides = array<i32>} : memref<4x8x8xbf16, #tpu.memory_space<vmem>>, vector<1x8x8xbf16>,
      %80 = vector.extract_strided_slice %63 {offsets = [0, 16], sizes = [8, 8], strides = [1, 1]} : vector<8x64xbf16> to vector<8x8xbf16>
      %c2 = arith.constant 2 : index
      %c0_40 = arith.constant 0 : index
      %c0_41 = arith.constant 0 : index
      %81 = vector.load %arg8[%c2, %c0_40, %c0_41] : memref<4x8x8xbf16, #tpu.memory_space<vmem>>, vector<1x8x8xbf16>
      %82 = vector.shape_cast %81 : vector<1x8x8xbf16> to vector<8x8xbf16>
      %83 = vector.shape_cast %80 : vector<8x8xbf16> to vector<1x8x8xbf16>
      tpu.vector_store %arg8[%c2, %c0_40, %c0_41], %83 {strides = array<i32>} : memref<4x8x8xbf16, #tpu.memory_space<vmem>>, vector<1x8x8xbf16>,
      %84 = vector.extract_strided_slice %63 {offsets = [0, 48], sizes = [8, 8], strides = [1, 1]} : vector<8x64xbf16> to vector<8x8xbf16>
      %c2_42 = arith.constant 2 : index
      %c0_43 = arith.constant 0 : index
      %c0_44 = arith.constant 0 : index
      %85 = vector.load %arg9[%c2_42, %c0_43, %c0_44] : memref<4x8x8xbf16, #tpu.memory_space<vmem>>, vector<1x8x8xbf16>
      %86 = vector.shape_cast %85 : vector<1x8x8xbf16> to vector<8x8xbf16>
      %87 = vector.shape_cast %84 : vector<8x8xbf16> to vector<1x8x8xbf16>
      tpu.vector_store %arg9[%c2_42, %c0_43, %c0_44], %87 {strides = array<i32>} : memref<4x8x8xbf16, #tpu.memory_space<vmem>>, vector<1x8x8xbf16>,
      %88 = vector.extract_strided_slice %63 {offsets = [0, 24], sizes = [8, 8], strides = [1, 1]} : vector<8x64xbf16> to vector<8x8xbf16>
      %c3 = arith.constant 3 : index
      %c0_45 = arith.constant 0 : index
      %c0_46 = arith.constant 0 : index
      %89 = vector.load %arg8[%c3, %c0_45, %c0_46] : memref<4x8x8xbf16, #tpu.memory_space<vmem>>, vector<1x8x8xbf16>
      %90 = vector.shape_cast %89 : vector<1x8x8xbf16> to vector<8x8xbf16>
      %91 = vector.shape_cast %88 : vector<8x8xbf16> to vector<1x8x8xbf16>
      tpu.vector_store %arg8[%c3, %c0_45, %c0_46], %91 {strides = array<i32>} : memref<4x8x8xbf16, #tpu.memory_space<vmem>>, vector<1x8x8xbf16>,
      %92 = vector.extract_strided_slice %63 {offsets = [0, 56], sizes = [8, 8], strides = [1, 1]} : vector<8x64xbf16> to vector<8x8xbf16>
      %c3_47 = arith.constant 3 : index
      %c0_48 = arith.constant 0 : index
      %c0_49 = arith.constant 0 : index
      %93 = vector.load %arg9[%c3_47, %c0_48, %c0_49] : memref<4x8x8xbf16, #tpu.memory_space<vmem>>, vector<1x8x8xbf16>
      %94 = vector.shape_cast %93 : vector<1x8x8xbf16> to vector<8x8xbf16>
      %95 = vector.shape_cast %92 : vector<8x8xbf16> to vector<1x8x8xbf16>
      tpu.vector_store %arg9[%c3_47, %c0_48, %c0_49], %95 {strides = array<i32>} : memref<4x8x8xbf16, #tpu.memory_space<vmem>>, vector<1x8x8xbf16>,
    } else {
    }
    %c0 = arith.constant 0 : index
    %c0_1 = arith.constant 0 : index
    %c0_2 = arith.constant 0 : index
    %3 = vector.load %arg2[%c0, %c0_1, %c0_2] : memref<1x8x32xf32, #tpu.memory_space<vmem>>, vector<1x8x32xf32>
    %4 = vector.shape_cast %3 : vector<1x8x32xf32> to vector<8x32xf32>
    %c0_3 = arith.constant 0 : index
    %c0_4 = arith.constant 0 : index
    %5 = vector.load %arg4[%c0_3, %c0_4] : memref<32x96xf32, #tpu.memory_space<vmem>>, vector<32x32xf32>
    %cst = arith.constant dense<0.000000e+00> : vector<8x32xf32>
    %6 = tpu.matmul %4, %5, %cst {dimension_numbers = #tpu.dot_dimension_numbers<[1], [0], [0], [1], [0, 0, 1, 1], [], []>} : vector<8x32xf32>, vector<32x32xf32>, vector<8x32xf32> -> vector<8x32xf32>
    %7 = arith.truncf %6 : vector<8x32xf32> to vector<8x32xbf16>
    %8 = vector.extract_strided_slice %7 {offsets = [0, 0], sizes = [8, 8], strides = [1, 1]} : vector<8x32xbf16> to vector<8x8xbf16>
    %9 = vector.extract_strided_slice %7 {offsets = [0, 8], sizes = [8, 8], strides = [1, 1]} : vector<8x32xbf16> to vector<8x8xbf16>
    %10 = vector.extract_strided_slice %7 {offsets = [0, 16], sizes = [8, 8], strides = [1, 1]} : vector<8x32xbf16> to vector<8x8xbf16>
    %11 = vector.extract_strided_slice %7 {offsets = [0, 24], sizes = [8, 8], strides = [1, 1]} : vector<8x32xbf16> to vector<8x8xbf16>
    %12 = vector.shape_cast %8 : vector<8x8xbf16> to vector<1x8x8xbf16>
    %13 = vector.shape_cast %9 : vector<8x8xbf16> to vector<1x8x8xbf16>
    %14 = vector.shape_cast %10 : vector<8x8xbf16> to vector<1x8x8xbf16>
    %15 = vector.shape_cast %11 : vector<8x8xbf16> to vector<1x8x8xbf16>
    %16 = tpu.concatenate %12, %13, %14, %15 in 0 : vector<1x8x8xbf16>, vector<1x8x8xbf16>, vector<1x8x8xbf16>, vector<1x8x8xbf16> -> vector<4x8x8xbf16>
    %c0_5 = arith.constant 0 : index
    %c0_6 = arith.constant 0 : index
    %c0_7 = arith.constant 0 : index
    %17 = vector.load %arg8[%c0_5, %c0_6, %c0_7] : memref<4x8x8xbf16, #tpu.memory_space<vmem>>, vector<4x8x8xbf16>
    %c0_8 = arith.constant 0 : index
    %c0_9 = arith.constant 0 : index
    %c0_10 = arith.constant 0 : index
    %18 = vector.load %arg9[%c0_8, %c0_9, %c0_10] : memref<4x8x8xbf16, #tpu.memory_space<vmem>>, vector<4x8x8xbf16>
    "tpu.trace_start"() <{level = 10 : i32, message = "hqd,hkd->hqk"}> : () -> ()
    %cst_11 = arith.constant dense<0.000000e+00> : vector<4x8x8xf32>
    %19 = tpu.matmul %16, %17, %cst_11 {dimension_numbers = #tpu.dot_dimension_numbers<[2], [2], [1], [1], [0, 0, 0, 1, 1, 1], [0], [0]>} : vector<4x8x8xbf16>, vector<4x8x8xbf16>, vector<4x8x8xf32> -> vector<4x8x8xf32>
    "tpu.trace_stop"() : () -> ()
    %c8_i32 = arith.constant 8 : i32
    %20 = arith.muli %arg1, %c8_i32 : i32
    %21 = tpu.iota {dimensions = array<i32: 0>} : vector<8x8xi32>
    %22 = vector.broadcast %20 : i32 to vector<8x8xi32>
    %23 = arith.addi %21, %22 : vector<8x8xi32>
    %24 = tpu.iota {dimensions = array<i32: 1>} : vector<8x8xi32>
    %25 = arith.cmpi sge, %23, %24 : vector<8x8xi32>
    %26 = vector.shape_cast %25 : vector<8x8xi1> to vector<1x8x8xi1>
    %cst_12 = arith.constant 0xFF800000 : f32
    %27 = vector.shape_cast %26 : vector<1x8x8xi1> to vector<1x8x8xi1>
    %28 = vector.broadcast %27 : vector<1x8x8xi1> to vector<4x8x8xi1>
    %29 = vector.broadcast %cst_12 : f32 to vector<4x8x8xf32>
    %30 = arith.select %28, %19, %29 : vector<4x8x8xi1>, vector<4x8x8xf32>
    %cst_13 = arith.constant dense<0xFF800000> : vector<4x8xf32>
    %31 = vector.multi_reduction <maximumf>, %30, %cst_13 [2] : vector<4x8x8xf32> to vector<4x8xf32>
    %32 = vector.shape_cast %31 : vector<4x8xf32> to vector<4x8x1xf32>
    %33 = vector.broadcast %32 : vector<4x8x1xf32> to vector<4x8x8xf32>
    %34 = arith.subf %30, %33 : vector<4x8x8xf32>
    %35 = math.exp %34 : vector<4x8x8xf32>
    %cst_14 = arith.constant dense<0.000000e+00> : vector<4x8xf32>
    %36 = vector.multi_reduction <add>, %35, %cst_14 [2] : vector<4x8x8xf32> to vector<4x8xf32>
    %37 = vector.shape_cast %36 : vector<4x8xf32> to vector<4x8x1xf32>
    %38 = vector.broadcast %37 : vector<4x8x1xf32> to vector<4x8x8xf32>
    %39 = arith.divf %35, %38 : vector<4x8x8xf32>
    %40 = arith.truncf %39 : vector<4x8x8xf32> to vector<4x8x8xbf16>
    "tpu.trace_start"() <{level = 10 : i32, message = "hqk,hkd->hqd"}> : () -> ()
    %cst_15 = arith.constant dense<0.000000e+00> : vector<4x8x8xf32>
    %41 = tpu.matmul %40, %18, %cst_15 {dimension_numbers = #tpu.dot_dimension_numbers<[2], [1], [1], [2], [0, 0, 0, 1, 1, 2], [0], [0]>} : vector<4x8x8xbf16>, vector<4x8x8xbf16>, vector<4x8x8xf32> -> vector<4x8x8xf32>
    "tpu.trace_stop"() : () -> ()
    %42 = vector.extract_strided_slice %41 {offsets = [0, 0, 0], sizes = [1, 8, 8], strides = [1, 1, 1]} : vector<4x8x8xf32> to vector<1x8x8xf32>
    %43 = vector.shape_cast %42 : vector<1x8x8xf32> to vector<8x8xf32>
    %44 = vector.extract_strided_slice %41 {offsets = [1, 0, 0], sizes = [1, 8, 8], strides = [1, 1, 1]} : vector<4x8x8xf32> to vector<1x8x8xf32>
    %45 = vector.shape_cast %44 : vector<1x8x8xf32> to vector<8x8xf32>
    %46 = vector.extract_strided_slice %41 {offsets = [2, 0, 0], sizes = [1, 8, 8], strides = [1, 1, 1]} : vector<4x8x8xf32> to vector<1x8x8xf32>
    %47 = vector.shape_cast %46 : vector<1x8x8xf32> to vector<8x8xf32>
    %48 = vector.extract_strided_slice %41 {offsets = [3, 0, 0], sizes = [1, 8, 8], strides = [1, 1, 1]} : vector<4x8x8xf32> to vector<1x8x8xf32>
    %49 = vector.shape_cast %48 : vector<1x8x8xf32> to vector<8x8xf32>
    %50 = tpu.concatenate %43, %45, %47, %49 in 1 : vector<8x8xf32>, vector<8x8xf32>, vector<8x8xf32>, vector<8x8xf32> -> vector<8x32xf32>
    %c0_16 = arith.constant 0 : index
    %c0_17 = arith.constant 0 : index
    %51 = vector.load %arg5[%c0_16, %c0_17] : memref<32x32xf32, #tpu.memory_space<vmem>>, vector<32x32xf32>
    %cst_18 = arith.constant dense<0.000000e+00> : vector<8x32xf32>
    %52 = tpu.matmul %50, %51, %cst_18 {dimension_numbers = #tpu.dot_dimension_numbers<[1], [0], [0], [1], [0, 0, 1, 1], [], []>} : vector<8x32xf32>, vector<32x32xf32>, vector<8x32xf32> -> vector<8x32xf32>
    %c0_19 = arith.constant 0 : index
    %c0_20 = arith.constant 0 : index
    %53 = vector.load %arg6[%c0_19, %c0_20] : memref<1x32xf32, #tpu.memory_space<vmem>>, vector<1x32xf32>
    %54 = vector.broadcast %53 : vector<1x32xf32> to vector<8x32xf32>
    %55 = arith.addf %52, %54 : vector<8x32xf32>
    %c0_21 = arith.constant 0 : index
    %c0_22 = arith.constant 0 : index
    %c0_23 = arith.constant 0 : index
    %56 = vector.load %arg7[%c0_21, %c0_22, %c0_23] : memref<1x8x32xf32, #tpu.memory_space<vmem>>, vector<1x8x32xf32>
    %57 = vector.shape_cast %56 : vector<1x8x32xf32> to vector<8x32xf32>
    %58 = vector.shape_cast %55 : vector<8x32xf32> to vector<1x8x32xf32>
    tpu.vector_store %arg7[%c0_21, %c0_22, %c0_23], %58 {strides = array<i32>} : memref<1x8x32xf32, #tpu.memory_space<vmem>>, vector<1x8x32xf32>,
    return
  }
  func.func @transform_0(%arg0: i32, %arg1: i32) -> (i32, i32, i32) {
    %c0_i32 = arith.constant 0 : i32
    %c0_i32_0 = arith.constant 0 : i32
    return %arg0, %arg1, %c0_i32 : i32, i32, i32
  }
  func.func @transform_1(%arg0: i32, %arg1: i32) -> (i32, i32, i32) {
    %c0_i32 = arith.constant 0 : i32
    %c0_i32_0 = arith.constant 0 : i32
    %c0_i32_1 = arith.constant 0 : i32
    return %arg0, %c0_i32, %c0_i32_0 : i32, i32, i32
  }
  func.func @transform_2(%arg0: i32, %arg1: i32) -> (i32, i32) {
    %c0_i32 = arith.constant 0 : i32
    %c0_i32_0 = arith.constant 0 : i32
    %c0_i32_1 = arith.constant 0 : i32
    return %c0_i32, %c0_i32_0 : i32, i32
  }
  func.func @transform_3(%arg0: i32, %arg1: i32) -> (i32, i32) {
    %c0_i32 = arith.constant 0 : i32
    %c0_i32_0 = arith.constant 0 : i32
    %c0_i32_1 = arith.constant 0 : i32
    return %c0_i32, %c0_i32_0 : i32, i32
  }
  func.func @transform_4(%arg0: i32, %arg1: i32) -> (i32, i32) {
    %c0_i32 = arith.constant 0 : i32
    %c0_i32_0 = arith.constant 0 : i32
    %c0_i32_1 = arith.constant 0 : i32
    return %c0_i32, %c0_i32_0 : i32, i32
  }
  func.func @transform_5(%arg0: i32, %arg1: i32) -> (i32, i32, i32) {
    %c0_i32 = arith.constant 0 : i32
    %c0_i32_0 = arith.constant 0 : i32
    return %arg0, %arg1, %c0_i32 : i32, i32, i32
  }
}

</mosaic_0001>

<bundles_post_ra>
// kernel: tpu_custom_call.1
= control target key start
LH: loop header
LB: loop body
LE: loop exit
PB: predicated region body
PF: predicated region fallthrough
CT: control target
= control target key end

     0   :  { %s2054_s0 = inlined_call_operand.hbm [shape: f32[2,8,32], index: 0, kind: input, shape index: {}]   ;;  %s2055_s1 = inlined_call_operand.hbm [shape: f32[2,8,32], index: 1, kind: input, shape index: {}]   ;;  %s2056_s2 = inlined_call_operand.hbm [shape: f32[32,96], index: 2, kind: input, shape index: {}]   ;;  %s2057_s3 = inlined_call_operand.hbm [shape: f32[32,32], index: 3, kind: input, shape index: {}]   ;;  %s2058_s4 = inlined_call_operand.vmem [shape: f32[1,32], index: 4, kind: input, shape index: {}]   ;;  %s2059_s5 = inlined_call_operand.hbm [shape: f32[2,8,32], index: 5, kind: output, shape index: {}]  }
   0x1   :  { %2061 = sst [smem:[#allocation18_spill]] %s2054_s0 }
   0x2   :  { %2062 = sst [smem:[#allocation19_spill]] %s2055_s1 }
   0x3   :  { %2063 = sst [smem:[#allocation20_spill]] %s2056_s2 }
   0x4   :  { %10 = vsyncpa [#allocation5], 0 }
   0x5   :  { %12 = vsyncpa [#allocation5 + $0x1], 0 }
   0x6   :  { %13 = vsyncpa [#allocation8], 0 }
   0x7   :  { %15 = vsyncpa [#allocation8 + $0x1], 0 }
   0x8   :  { %16 = vsyncpa [#allocation11], 0 }
   0x9   :  { %17 = vsyncpa [#allocation6], 0 }
   0xa   :  { %19 = vsyncpa [#allocation6 + $0x1], 0  ;;  %s1744_s18 = smov 0   ;;  %s1746_s19 = smov 0  }
   0xb   :  { %s1748_s20 = smov 0   ;;  %s1750_s21 = smov 0  }
   0xc   :  { %s1752_s22 = smov 0   ;;  %s1754_s23 = smov 0  }
   0xd LB: > { %s1775_s24 = sadd.s32 4294967295, %s1693_s23   ;;  %s1230_s25 = sadd.s32 4294967294, %s1693_s23   ;;  %s1693_s23 = sphi %s1754_s23, %s25_s23   ;;  %s1689_s22 = sphi %s1752_s22, %s2084_s22   ;;  %s1685_s21 = sphi %s1750_s21, %s2083_s21   ;;  %s1681_s20 = sphi %s1748_s20, %s2082_s20   ;;  %s1677_s19 = sphi %s1746_s19, %s2081_s19   ;;  %s1673_s18 = sphi %s1744_s18, %s2080_s18  }
   0xe   : > { %p59_p0 = scmp.ne.s32.totalorder %s1677_s19, %s1673_s18  ;;  %p2060_p1 = scmp.eq.s32.totalorder %s1775_s24, 0 }
   0xf   : > { %p180_p3 = scmp.eq.s32.totalorder %s1230_s25, 1  ;;  %p1231_p5 = scmp.ge.s32.totalorder %s1693_s23, 1 }
  0x10   : > { %p1784_p4 = por %p2060_p1, %p59_p0  ;;  %p187_p7 = scmp.lt.s32.totalorder %s1693_s23, 3 }
  0x11   : > { %p1789_p6 = por %p180_p3, %p59_p0  ;;  %s1695_s29 = smov [#allocation9]  }
  0x12   : > { %p1794_p8 = pnand %p1231_p5, %p187_p7  ;;  %s199_s30 = sshll.u32 %s1695_s29, 4  ;;  %s200_s30 = int_to_ptr.vmem [resolvable:$true] %s199_s30 }
  0x13   : > { %s2065_s27 = scalar_select %p1789_p6, 1, 0 }
  0x14   : > { %p1389_p9 = pneg %p1794_p8  ;;  %s1696_s7 = smov [#allocation10]  }
  0x15   : > { %s212_s8 = sshll.u32 %s1696_s7, 4  ;;  %s1504_s9 = scalar_lea.vmem %s200_s30, 512  ;;  %s213_s8 = int_to_ptr.vmem [resolvable:$true] %s212_s8 }
  0x16   : > { %p1803_p11 = pnand %p1389_p9, %p2060_p1  ;;  %p1505_p13 = scmp.ne.s32.totalorder %s200_s30, %s1504_s9 }
  0x17   : > { %p1512_p5 = scmp.lt.s32.totalorder %s200_s30, %s200_s30  ;;  %p1513_p7 = scmp.lt.s32.totalorder %s1504_s9, %s1504_s9 }
  0x18   : > { %p1495_p12 = pneg %p1803_p11 }
  0x19   : > { %p1514_p10 = por %p1513_p7, %p1512_p5 }
  0x1a   : > { %p1507_p0 = pnand %p1505_p13, %p1495_p12 }
  0x1c   : > { %p1508_p3 = pneg %p1507_p0 }
  0x1e   : > { %p1515_p9 = pnand %p1514_p10, %p1508_p3 }
  0x20   : > { %1518 = shalt.err (!%p1515_p9)
}
  0x21   : > { %s1697_s10 = smov 128   ;;  %s1698_s11 = smov 8  }
  0x22   : > { %s2068_s2 = sld [smem:[#allocation20_spill]]  ;;  %s1530_s14 = scalar_lea.vmem %s213_s8, 512 }
  0x23   : > { %p1531_p1 = scmp.ne.s32.totalorder %s213_s8, %s1530_s14  ;;  %p1538_p2 = scmp.lt.s32.totalorder %s213_s8, %s213_s8 }
  0x24   : > { %p1539_p6 = scmp.lt.s32.totalorder %s1530_s14, %s1530_s14 }
  0x25   : > { %p1533_p13 = pnand %p1531_p1, %p1495_p12 }
  0x26   : > { %p1540_p5 = por %p1539_p6, %p1538_p2 }
  0x27   : > { %p1534_p0 = pneg %p1533_p13 }
  0x28   : > { %1392 = dma.hbm_to_vmem [thread:$0]  (!%p1803_p11), %s2068_s2, 512, %s200_s30, [#allocation8], %s1697_s10, %s1697_s10, %s1698_s11  }
  0x29   : > { %p1541_p10 = pnand %p1540_p5, %p1534_p0 }
  0x2b   : > { %1544 = shalt.err (!%p1541_p10)
}
  0x2c   : > { %1395 = dma.hbm_to_vmem [thread:$0]  (!%p1803_p11), %s2057_s3, 512, %s213_s8, [#allocation11], %s1697_s10, %s1697_s10, %s1698_s11  }
  0x2d   : > { %s37_s17 = sadd.s32 1, %s1689_s22  ;;  %s46_s25 = sadd.s32 1, %s1681_s20 }
  0x2e   : > { %p39_p1 = scmp.ge.s32.totalorder %s37_s17, 2  ;;  %p53_p2 = scmp.ne.s32.totalorder %s1681_s20, %s1677_s19 }
  0x2f   : > { %p54_p6 = scmp.eq.s32.totalorder %s1693_s23, 0  ;;  %p1409_p12 = scmp.lt.s32.totalorder %s1693_s23, 2 }
  0x30   : > { %s2086_s17 = smov (%p39_p1, %s37_s17), 0  ;;  %p2069_p7 = scmp.eq.s32.totalorder %s1775_s24, 1 }
  0x31   : > { %p55_p3 = por %p54_p6, %p53_p2  ;;  %s41_s30 = ssub.s32 %s1689_s22, %s2086_s17 }
  0x32   : > { %p1835_p9 = por %p2069_p7, %p53_p2  ;;  %s229_s6 = sand.u32 1, %s1681_s20  }
  0x33   : > { %p44_p13 = scmp.eq.s32.totalorder %s41_s30, 0  ;;  %s1235_s7 = sshll.u32 %s229_s6, 3 }
  0x34   : > { %s1236_s8 = sshll.u32 %s1689_s22, 7  ;;  %s2071_s0 = sld [smem:[#allocation18_spill]] }
  0x35   : > { %s1844_s9 = scalar_select %p44_p13, %s1681_s20, %s46_s25  }
  0x36   : > { %s233_s13 = scalar_lea.vmem [#allocation4], %s1235_s7  ;;  %p1851_p11 = pnand %p1409_p12, %p55_p3 }
  0x37   : > { %s241_s14 = sshll.u32 %s233_s13, 4  ;;  %s2073_s1 = sld [smem:[#allocation19_spill]]  ;;  %s242_s14 = int_to_ptr.vmem [resolvable:$true] %s241_s14 }
  0x38   : > { %s230_s25 = scalar_lea.sflag [#allocation5], %s229_s6  ;;  %p1547_p0 = pneg %p1851_p11 }
  0x39   : > { %s1558_s10 = scalar_lea.vmem %s242_s14, 128  ;;  %s1699_s11 = smov [#allocation4]  }
  0x3a   : > { %s239_s12 = scalar_lea.hbm %s2071_s0, %s1236_s8  ;;  %p1559_p5 = scmp.ne.s32.totalorder %s242_s14, %s1558_s10 }
  0x3b   : > { %s1563_s13 = sshll.u32 %s1699_s11, 4  ;;  %s1564_s13 = int_to_ptr.vmem [resolvable:$false] %s1563_s13 }
  0x3c   : > { %p1561_p10 = pnand %p1559_p5, %p1547_p0  ;;  %s1565_s0 = scalar_lea.vmem %s1564_s13, 256 }
  0x3d   : > { %s1858_s2 = scalar_lea.hbm %s2073_s1, %s1236_s8  ;;  %p1566_p2 = scmp.lt.s32.totalorder %s242_s14, %s1564_s13 }
  0x3e   : > { %p1562_p1 = pneg %p1561_p10  ;;  %p1567_p6 = scmp.lt.s32.totalorder %s1565_s0, %s1558_s10 }
  0x40   : > { %p1568_p12 = por %p1567_p6, %p1566_p2 }
  0x42   : > { %p1569_p3 = pnand %p1568_p12, %p1562_p1 }
  0x44   : > { %1572 = shalt.err (!%p1569_p3)
}
  0x45   : > { %1399 = dma.hbm_to_vmem [thread:$0]  (!%p1851_p11), %s239_s12, 128, %s242_s14, %s230_s25  }
  0x46   : > { %s248_s6 = sand.u32 1, %s1693_s23   ;;  %s252_s8 = scalar_lea.vmem [#allocation7], %s1235_s7 }
  0x47   : > { %s259_s16 = sshll.u32 %s252_s8, 4  ;;  %s249_s30 = scalar_lea.sflag [#allocation8], %s248_s6  ;;  %s260_s16 = int_to_ptr.vmem [resolvable:$true] %s259_s16 }
  0x48   : > { %s1586_s1 = scalar_lea.vmem %s260_s16, 128  ;;  %s1700_s0 = smov [#allocation7]  }
  0x49   : > { %p1587_p7 = scmp.ne.s32.totalorder %s260_s16, %s1586_s1  ;;  %s1591_s10 = sshll.u32 %s1700_s0, 4  ;;  %s1592_s10 = int_to_ptr.vmem [resolvable:$false] %s1591_s10 }
  0x4a   : > { %s1593_s11 = scalar_lea.vmem %s1592_s10, 256  ;;  %p1594_p10 = scmp.lt.s32.totalorder %s260_s16, %s1592_s10 }
  0x4b   : > { %p1589_p13 = pnand %p1587_p7, %p1547_p0  ;;  %p1595_p1 = scmp.lt.s32.totalorder %s1593_s11, %s1586_s1 }
  0x4d   : > { %p1590_p5 = pneg %p1589_p13  ;;  %p1596_p2 = por %p1595_p1, %p1594_p10 }
  0x4f   : > { %p1597_p6 = pnand %p1596_p2, %p1590_p5 }
  0x51   : > { %1600 = shalt.err (!%p1597_p6)
}
  0x52   : > { %1402 = dma.hbm_to_vmem [thread:$0]  (!%p1851_p11), %s1858_s2, 128, %s260_s16, %s249_s30  }
  0x53   : > { %268 = sbr.rel (%p1794_p8) target bundleno = 1590 (0x636), region = 40  ;;  %s1877_s7 = sand.u32 (!%p1794_p8), 1, %s1677_s19  }
  0x54   : > { %s1880_s12 = sshll.u32 (!%p1794_p8), %s1877_s7, 3  ;;  %s271_s1 = scalar_lea.sflag (!%p1794_p8), [#allocation5], %s1877_s7 }
  0x55   : > { %s274_s14 = scalar_lea.vmem (!%p1794_p8), [#allocation4], %s1880_s12 }
  0x58   : > { %1652 = dma.done.wait (%p1784_p4), %s271_s1, 128  }
  0x59   : > { %1654 = vsyncadd (%p1784_p4), %s271_s1, 4294967168  ;;  %s279_s2 = sand.u32 1, %s1775_s24   ;;  %s283_s15 = scalar_lea.vmem [#allocation7], %s1880_s12 }
  0x5a   : > { %s280_s28 = scalar_lea.sflag [#allocation8], %s279_s2 }
  0x5b   : > { %1656 = dma.done.wait (%p1784_p4), %s280_s28, 128  }
  0x5c   : > { %1658 = vsyncadd (%p1784_p4), %s280_s28, 4294967168  ;;  %p2074_p8 = scmp.eq.s32.totalorder %s1775_s24, 0 }
  0x5e   : > { %1660 = dma.done.wait (%p2074_p8), [#allocation8], 512   ;;  %p2075_p11 = pmov %p2074_p8 }
  0x5f   : > { %p2076_p0 = pmov %p2074_p8 }
  0x60   : > { %1662 = vsyncadd (%p2075_p11), [#allocation8], 4294966784 }
  0x61   : > { %1664 = dma.done.wait (%p2076_p0), [#allocation11], 512   ;;  %p2077_p12 = pmov %p2076_p0 }
  0x62   : > { %v1701_v0 = vmov 0.0   ;;  %vm1702_vm0 = vmmov 0   ;;  %v332_v1 = vld [vmem:[#allocation9 + $0x18] sm:$0xff]  ;;  %v330_v2 = vld [vmem:[#allocation9 + $0x8] sm:$0xff]  ;;  %s1703_s26 = smov 96   ;;  %v331_v3 = vld [vmem:[#allocation9 + $0x10] sm:$0xff]  ;;  %v744_v31 = vlaneseq }
  0x63   : > { %1666 = vsyncadd (%p2077_p12), [#allocation11], 4294966784  ;;  %1294 = vmatprep.subr.mxu0 %v1701_v0  ;;  %1305 = vmatprep.subr.mxu1 %v1701_v0  ;;  %v329_v4 = vld [vmem:[#allocation9] sm:$0xff]  ;;  %vm349_vm1 = vcmask 261120   ;;  %v328_v10 = vld [vmem:[%s283_s15] sm:$0xff]  ;;  %vm424_vm2 = vcmask 60416  }
  0x64   : > { %1302 = vmatprep.mubr.msk.f32.mxu0 %vm1702_vm0, %v1701_v0  ;;  %1313 = vmatprep.mubr.msk.f32.mxu1 %vm1702_vm0, %v1701_v0  ;;  %v463_v5 = vld [vmem:[%s274_s14] sm:$0xff]  ;;  %s1704_s24 = smov 112   ;;  %s1705_s25 = smov 120   ;;  %vm558_vm3 = vcmask 64512   ;;  %v745_v32 = vshrl.u32 %v744_v31, 7  ;;  %v749_v33 = vand.u32 127, %v744_v31 }
  0x65   : > { %343 = vrot.lane.b32.xlu0 %v332_v1, %s1703_s26  ;;  %339 = vrot.lane.b32.xlu1 %v330_v2, %s1703_s26  ;;  %s1706_s13 = smov 104   ;;  %vm808_vm5 = vcmask 1043456   ;;  %s1707_s6 = smov 80   ;;  %vm1003_vm6 = vcmask 130048   ;;  %vm1005_vm7 = vcmask 195584  }
  0x66   : > { %1306 = vmatpush3.msra.mxu1 %v332_v1  ;;  %vm750_vm4 = vcmp.ge.s32.totalorder %v745_v32, %v749_v33  ;;  %s1708_s8 = smov 72   ;;  %s1709_s16 = smov 88  }
  0x67   : > { %1307 = vmatprep.subr.mxu1 %v1701_v0  ;;  %s1710_s30 = smov 16   ;;  %s1711_s0 = smov 8  }
  0x68   : > { %1308 = vmatpush3.msra.mxu1 %v331_v3  ;;  %s1712_s10 = smov 24   ;;  %s1259_s14 = sshll.u32 %s1685_s21, 7 }
  0x69   : > { %341 = vrot.lane.b32.xlu0 %v331_v3, %s1703_s26  ;;  %337 = vrot.lane.b32.xlu1 %v329_v4, %s1703_s26  ;;  %s322_s2 = scalar_lea.vmem [#allocation12], %s1880_s12  ;;  %s1713_s21 = smov [#allocation12]  }
  0x6a   : > { %1309 = vmatprep.subr.mxu1 %v1701_v0  ;;  %s1107_s28 = sshll.u32 %s322_s2, 4  ;;  %s1605_s12 = sshll.u32 %s1713_s21, 4  ;;  %s1108_s28 = int_to_ptr.vmem [resolvable:$true] %s1107_s28  ;;  %s1606_s12 = int_to_ptr.vmem [resolvable:$false] %s1605_s12 }
  0x6b   : > { %1310 = vmatpush3.msra.mxu1 %v330_v2  ;;  %p1608_p13 = scmp.lt.s32.totalorder %s1108_s28, %s1606_s12 }
  0x6c   : > { %1311 = vmatprep.subr.mxu1 %v1701_v0 }
  0x6d   : > { %1312 = vmatpush3.msra.mxu1 %v329_v4 }
  0x6e   : > { %1314 = vmatmul.mubr.msk.f32.vlgmr.msra.gmra.mxu1 %vm349_vm1, %v463_v5  ;;  %1322 = vmatprep.subr.bf16.mxu1 %v1701_v0 }
  0x6f   : > { %1324 = vmatprep.mubr.msk.bf16.mxu1 %vm1702_vm0, %v1701_v0 }
  0xd7   : > { %v344_v6 = vpop.permute.xlu0 %343  ;;  %v340_v7 = vpop.permute.xlu1 %339 }
  0xd8   : > { %1295 = vmatpush3.msra.mxu0 %v344_v6 }
  0xd9   : > { %1296 = vmatprep.subr.mxu0 %v1701_v0 }
  0xdb   : > { %v342_v8 = vpop.permute.xlu0 %341  ;;  %v338_v9 = vpop.permute.xlu1 %337 }
  0xdc   : > { %1297 = vmatpush3.msra.mxu0 %v342_v8 }
  0xdd   : > { %1298 = vmatprep.subr.mxu0 %v1701_v0 }
  0xde   : > { %1299 = vmatpush3.msra.mxu0 %v340_v7 }
  0xdf   : > { %1300 = vmatprep.subr.mxu0 %v1701_v0 }
  0xe0   : > { %1301 = vmatpush3.msra.mxu0 %v338_v9 }
  0xe1   : > { %1303 = vmatmul.mubr.msk.f32.vlgmr.msra.gmra.mxu0 %vm349_vm1, %v328_v10  ;;  %1316 = vmatprep.subr.bf16.mxu0 %v1701_v0 }
  0xe2   : > { %1318 = vmatprep.mubr.msk.bf16.mxu0 %vm1702_vm0, %v1701_v0 }
 0x12e   : > { %v538_v11 = vpop.f32.mrf.mxu1 }
 0x12f   : > { %v542_v16 = vpack.c.bf16 %v538_v11, %v538_v11 }
 0x130   : > { %v1315_v12 = vpop.f32.mrf.mxu1 }
 0x1a1   : > { %v419_v13 = vpop.f32.mrf.mxu0 }
 0x1a2   : > { %v1930_v14 = vpack.c.bf16 %v419_v13, %v419_v13 }
 0x1a3   : > { %v1304_v15 = vpop.f32.mrf.mxu0 }
 0x1a4   : > { %425 = vst.msk [vmem:[#allocation2] sm:$0xf] %vm424_vm2, %v1930_v14  ;;  %443 = vrot.lane.b32.xlu1 %v1930_v14, %s1704_s24  ;;  %433 = vrot.lane.b32.xlu0 %v1930_v14, %s1705_s25 }
 0x1a8   : > { %453 = vrot.lane.b32.xlu0 %v1930_v14, %s1706_s13  ;;  %544 = vrot.lane.b32.xlu1 %v542_v16, %s1705_s25  ;;  %s1093_s25 = scalar_lea.sflag [#allocation6], %s1877_s7 }
 0x1ab   : > { %v550_v17 = vld [vmem:[#allocation2] sm:$0xf] }
 0x1ac   : > { %v563_v18 = vsel %vm558_vm3, %v550_v17, 0  ;;  %548 = vrot.lane.b32.xlu1 %v542_v16, %s1706_s13  ;;  %546 = vrot.lane.b32.xlu0 %v542_v16, %s1704_s24  ;;  %s2011_s24 = scalar_lea.hbm %s2059_s5, %s1259_s14  ;;  %s1601_s13 = scalar_lea.vmem %s1108_s28, 128 }
 0x1ad   : > { %1317 = vmatpush3.bf16.xpose.msra.mxu0 %v563_v18  ;;  %p1602_p4 = scmp.ne.s32.totalorder %s1108_s28, %s1601_s13 }
 0x1ae   : > { %1328 = vmatprep.subr.bf16.mxu0 %v1701_v0 }
 0x1af   : > { %p1603_p3 = pnand %p1602_p4, %p1835_p9 }
 0x1b1   : > { %p1604_p7 = pneg %p1603_p3 }
 0x1b4   : > { %1319 = vmatmul.mubr.msk.bf16.vlgmr.msra.gmra.mxu0 %vm558_vm3, %v542_v16 }
 0x1b5   : > { %1330 = vmatprep.mubr.msk.bf16.mxu0 %vm1702_vm0, %v1701_v0 }
 0x216   : > { %v444_v19 = vpop.permute.xlu1 %443  ;;  %v434_v20 = vpop.permute.xlu0 %433 }
 0x217   : > { %447 = vst.msk [vmem:[#allocation2 + $0x8] sm:$0xf] %vm424_vm2, %v444_v19  ;;  %437 = vst.msk [vmem:[#allocation2 + $0x4] sm:$0xf] %vm424_vm2, %v434_v20 }
 0x21a   : > { %v454_v21 = vpop.permute.xlu0 %453  ;;  %v545_v28 = vpop.permute.xlu1 %544 }
 0x21b   : > { %457 = vst.msk [vmem:[#allocation2 + $0xc] sm:$0xf] %vm424_vm2, %v454_v21 }
 0x21e   : > { %v551_v22 = vld [vmem:[#allocation2 + $0x4] sm:$0xf]  ;;  %v552_v23 = vld [vmem:[#allocation2 + $0x8] sm:$0xf]  ;;  %v547_v26 = vpop.permute.xlu0 %546  ;;  %v549_v30 = vpop.permute.xlu1 %548 }
 0x21f   : > { %v609_v24 = vsel %vm558_vm3, %v551_v22, 0  ;;  %v655_v25 = vsel %vm558_vm3, %v552_v23, 0 }
 0x220   : > { %1323 = vmatpush3.bf16.xpose.msra.mxu1 %v609_v24  ;;  %1329 = vmatpush3.bf16.xpose.msra.mxu0 %v655_v25 }
 0x221   : > { %1334 = vmatprep.subr.bf16.mxu1 %v1701_v0  ;;  %1340 = vmatprep.subr.bf16.mxu0 %v1701_v0 }
 0x222   : > { %v553_v27 = vld [vmem:[#allocation2 + $0xc] sm:$0xf] }
 0x223   : > { %v701_v29 = vsel %vm558_vm3, %v553_v27, 0 }
 0x227   : > { %1325 = vmatmul.mubr.msk.bf16.vlgmr.msra.gmra.mxu1 %vm558_vm3, %v545_v28  ;;  %1331 = vmatmul.mubr.msk.bf16.vlgmr.msra.gmra.mxu0 %vm558_vm3, %v547_v26 }
 0x228   : > { %1335 = vmatpush3.bf16.xpose.msra.mxu1 %v701_v29  ;;  %1336 = vmatprep.mubr.msk.bf16.mxu1 %vm1702_vm0, %v1701_v0 }
 0x229   : > { %1342 = vmatprep.mubr.msk.bf16.mxu0 %vm1702_vm0, %v1701_v0  ;;  %1346 = vmatprep.subr.bf16.mxu1 %v1701_v0 }
 0x22f   : > { %1337 = vmatmul.mubr.msk.bf16.vlgmr.msra.gmra.mxu1 %vm558_vm3, %v549_v30 }
 0x230   : > { %1348 = vmatprep.mubr.msk.bf16.mxu1 %vm1702_vm0, %v1701_v0 }
 0x274   : > { %v599_v34 = vpop.f32.mrf.mxu0 }
 0x275   : > { %v753_v35 = vsel %vm750_vm4, %v599_v34, -inf }
 0x276   : > { %v1320_v36 = vpop.f32.mrf.mxu0  ;;  %v757_v37 = vsel %vm558_vm3, %v753_v35, -inf }
 0x277   : > { %758 = vmax.xlane.f32.xlu0 %v757_v37 }
 0x278   : > { %v602_v38 = vpop.f32.mrf.mxu0 }
 0x27a   : > { %v1321_v39 = vpop.f32.mrf.mxu0 }
 0x2e7   : > { %v645_v40 = vpop.f32.mrf.mxu1  ;;  %v691_v41 = vpop.f32.mrf.mxu0 }
 0x2e8   : > { %v754_v42 = vsel %vm750_vm4, %v645_v40, -inf  ;;  %v755_v43 = vsel %vm750_vm4, %v691_v41, -inf }
 0x2e9   : > { %v1326_v44 = vpop.f32.mrf.mxu1  ;;  %v1332_v45 = vpop.f32.mrf.mxu0  ;;  %v760_v46 = vsel %vm558_vm3, %v754_v42, -inf  ;;  %v763_v47 = vsel %vm558_vm3, %v755_v43, -inf }
 0x2ea   : > { %761 = vmax.xlane.f32.xlu1 %v760_v46  ;;  %764 = vmax.xlane.f32.xlu0 %v763_v47  ;;  %v1010_v47 = vld [vmem:[#allocation10 + $0x18] sm:$0xff] }
 0x2eb   : > { %v648_v48 = vpop.f32.mrf.mxu1  ;;  %v694_v49 = vpop.f32.mrf.mxu0 }
 0x2ec   : > { %v1009_v48 = vld [vmem:[#allocation10 + $0x10] sm:$0xff]  ;;  %v1008_v49 = vld [vmem:[#allocation10 + $0x8] sm:$0xff] }
 0x2ed   : > { %v1327_v50 = vpop.f32.mrf.mxu1  ;;  %v1333_v51 = vpop.f32.mrf.mxu0 }
 0x2ee   : > { %v1007_v51 = vld [vmem:[#allocation10] sm:$0xff] }
 0x2ef   : > { %v737_v52 = vpop.f32.mrf.mxu1 }
 0x2f0   : > { %v756_v53 = vsel %vm750_vm4, %v737_v52, -inf }
 0x2f1   : > { %v1338_v54 = vpop.f32.mrf.mxu1  ;;  %v766_v55 = vsel %vm558_vm3, %v756_v53, -inf }
 0x2f2   : > { %767 = vmax.xlane.f32.xlu0 %v766_v55 }
 0x2f3   : > { %v740_v56 = vpop.f32.mrf.mxu1 }
 0x2f5   : > { %v1339_v57 = vpop.f32.mrf.mxu1 }
 0x2fb   : > { %429 = vrot.lane.b32.xlu1 %v1930_v14, %s1703_s26 }
 0x300   : > { %v759_v58 = vpop.xlane.xlu0 %758 }
 0x301   : > { %v769_v59 = vsub.f32 %v753_v35, %v759_v58 }
 0x303   : > { %v773_v60 = vmul.f32 1.442695, %v769_v59 }
 0x305   : > { %1477 = vpow2.f32 %v773_v60 }
 0x312   : > { %v1478_v61 = vpop.eup %1477 }
 0x313   : > { %v781_v62 = vsel %vm558_vm3, %v1478_v61, 0.0 }
 0x31f   : > { %782 = vadd.xlane.f32.xlu1 %v781_v62 }
 0x373   : > { %v762_v63 = vpop.xlane.xlu1 %761  ;;  %v765_v1 = vpop.xlane.xlu0 %764 }
 0x374   : > { %v770_v2 = vsub.f32 %v754_v42, %v762_v63  ;;  %v771_v3 = vsub.f32 %v755_v43, %v765_v1 }
 0x376   : > { %v775_v4 = vmul.f32 1.442695, %v770_v2  ;;  %v777_v5 = vmul.f32 1.442695, %v771_v3 }
 0x377   : > { %v430_v6 = vpop.permute.xlu1 %429 }
 0x378   : > { %1479 = vpow2.f32 %v775_v4  ;;  %432 = vst.msk [vmem:[#allocation3] sm:$0xf] %vm424_vm2, %v430_v6 }
 0x379   : > { %1481 = vpow2.f32 %v777_v5  ;;  %v1256_v5 = vld [vmem:[%s2058_s4] ss:$0 sm:$0xff] }
 0x37b   : > { %v768_v7 = vpop.xlane.xlu0 %767 }
 0x37c   : > { %v772_v8 = vsub.f32 %v756_v53, %v768_v7 }
 0x37e   : > { %v779_v9 = vmul.f32 1.442695, %v772_v8 }
 0x37f   : > { %v554_v10 = vld [vmem:[#allocation3] sm:$0xf] }
 0x380   : > { %1483 = vpow2.f32 %v779_v9  ;;  %v810_v11 = vsel %vm808_vm5, %v554_v10, 0 }
 0x381   : > { %1341 = vmatpush3.bf16.msra.mxu0 %v810_v11 }
 0x382   : > { %1352 = vmatprep.subr.bf16.mxu0 %v1701_v0 }
 0x385   : > { %v1480_v12 = vpop.eup %1479 }
 0x386   : > { %v1482_v13 = vpop.eup %1481  ;;  %v784_v15 = vsel %vm558_vm3, %v1480_v12, 0.0 }
 0x387   : > { %785 = vadd.xlane.f32.xlu0 %v784_v15  ;;  %v787_v16 = vsel %vm558_vm3, %v1482_v13, 0.0 }
 0x388   : > { %788 = vadd.xlane.f32.xlu1 %v787_v16 }
 0x38d   : > { %v1484_v17 = vpop.eup %1483 }
 0x38e   : > { %v790_v18 = vsel %vm558_vm3, %v1484_v17, 0.0 }
 0x38f   : > { %791 = vadd.xlane.f32.xlu0 %v790_v18 }
 0x399   : > { %448 = vrot.lane.b32.xlu1 %v1930_v14, %s1707_s6  ;;  %s1607_s6 = scalar_lea.vmem %s1606_s12, 256 }
 0x39a   : > { %p1609_p5 = scmp.lt.s32.totalorder %s1607_s6, %s1601_s13 }
 0x39c   : > { %p1610_p10 = por %p1609_p5, %p1608_p13 }
 0x39d   : > { %458 = vrot.lane.b32.xlu1 %v1930_v14, %s1708_s8 }
 0x39e   : > { %p1611_p1 = pnand %p1610_p10, %p1604_p7 }
 0x3a5   : > { %438 = vrot.lane.b32.xlu0 %v1930_v14, %s1709_s16 }
 0x3a8   : > { %v783_v19 = vpop.xlane.xlu1 %782 }
 0x3a9   : > { %1485 = vrcp.f32 %v783_v19 }
 0x3b6   : > { %v1486_v20 = vpop.eup %1485 }
 0x3b7   : > { %v794_v21 = vmul.f32 %v1486_v20, %v1478_v61 }
 0x3b9   : > { %v801_v22 = vpack.c.bf16 %v794_v21, %v794_v21 }
 0x3bb   : > { %1343 = vmatmul.mubr.msk.bf16.vlgmr.msra.gmra.mxu0 %vm558_vm3, %v801_v22 }
 0x3bc   : > { %1354 = vmatprep.mubr.msk.bf16.mxu0 %vm1702_vm0, %v1701_v0 }
 0x410   : > { %v786_v23 = vpop.xlane.xlu0 %785 }
 0x411   : > { %v789_v24 = vpop.xlane.xlu1 %788 }
 0x412   : > { %1487 = vrcp.f32 %v789_v24 }
 0x413   : > { %1489 = vrcp.f32 %v786_v23 }
 0x415   : > { %v449_v25 = vpop.permute.xlu1 %448 }
 0x416   : > { %452 = vst.msk [vmem:[#allocation3 + $0x8] sm:$0xf] %vm424_vm2, %v449_v25 }
 0x418   : > { %v792_v26 = vpop.xlane.xlu0 %791 }
 0x419   : > { %v459_v27 = vpop.permute.xlu1 %458  ;;  %1491 = vrcp.f32 %v792_v26 }
 0x41a   : > { %462 = vst.msk [vmem:[#allocation3 + $0xc] sm:$0xf] %vm424_vm2, %v459_v27 }
 0x41c   : > { %v439_v14 = vpop.permute.xlu0 %438 }
 0x41d   : > { %442 = vst.msk [vmem:[#allocation3 + $0x4] sm:$0xf] %vm424_vm2, %v439_v14  ;;  %v556_v28 = vld [vmem:[#allocation3 + $0x8] sm:$0xf] }
 0x41e   : > { %v902_v29 = vsel %vm808_vm5, %v556_v28, 0 }
 0x41f   : > { %v1488_v30 = vpop.eup %1487  ;;  %1353 = vmatpush3.bf16.msra.mxu0 %v902_v29 }
 0x420   : > { %v1490_v31 = vpop.eup %1489  ;;  %v798_v32 = vmul.f32 %v1488_v30, %v1482_v13  ;;  %1364 = vmatprep.subr.mxu0 %v1701_v0 }
 0x421   : > { %v796_v34 = vmul.f32 %v1490_v31, %v1480_v12  ;;  %v557_v37 = vld [vmem:[#allocation3 + $0xc] sm:$0xf] }
 0x422   : > { %v803_v33 = vpack.c.bf16 %v798_v32, %v798_v32  ;;  %v948_v40 = vsel %vm808_vm5, %v557_v37, 0 }
 0x423   : > { %v802_v38 = vpack.c.bf16 %v796_v34, %v796_v34 }
 0x424   : > { %1355 = vmatmul.mubr.msk.bf16.vlgmr.msra.gmra.mxu0 %vm558_vm3, %v803_v33  ;;  %v555_v35 = vld [vmem:[#allocation3 + $0x4] sm:$0xf] }
 0x425   : > { %v856_v36 = vsel %vm808_vm5, %v555_v35, 0  ;;  %1372 = vmatprep.mubr.msk.f32.mxu0 %vm1702_vm0, %v1701_v0  ;;  %1365 = vmatpush3.msra.mxu0 %v1010_v47 }
 0x426   : > { %1347 = vmatpush3.bf16.msra.mxu1 %v856_v36  ;;  %v1492_v39 = vpop.eup %1491  ;;  %1366 = vmatprep.subr.mxu0 %v1701_v0 }
 0x427   : > { %1358 = vmatprep.subr.bf16.mxu1 %v1701_v0  ;;  %v800_v41 = vmul.f32 %v1492_v39, %v1484_v17  ;;  %1367 = vmatpush3.msra.mxu0 %v1009_v48 }
 0x428   : > { %1368 = vmatprep.subr.mxu0 %v1701_v0 }
 0x429   : > { %1349 = vmatmul.mubr.msk.bf16.vlgmr.msra.gmra.mxu1 %vm558_vm3, %v802_v38  ;;  %v804_v42 = vpack.c.bf16 %v800_v41, %v800_v41  ;;  %1369 = vmatpush3.msra.mxu0 %v1008_v49 }
 0x42a   : > { %1359 = vmatpush3.bf16.msra.mxu1 %v948_v40  ;;  %1360 = vmatprep.mubr.msk.bf16.mxu1 %vm1702_vm0, %v1701_v0 }
 0x42b   : > { %1370 = vmatprep.subr.mxu0 %v1701_v0 }
 0x42c   : > { %1371 = vmatpush3.msra.mxu0 %v1007_v51 }
 0x431   : > { %1361 = vmatmul.mubr.msk.bf16.vlgmr.msra.gmra.mxu1 %vm558_vm3, %v804_v42 }
 0x47b   : > { %v846_v43 = vpop.f32.mrf.mxu0 }
 0x47d   : > { %v1344_v44 = vpop.f32.mrf.mxu0 }
 0x47f   : > { %v849_v45 = vpop.f32.mrf.mxu0 }
 0x481   : > { %v1345_v46 = vpop.f32.mrf.mxu0 }
 0x4e4   : > { %v938_v50 = vpop.f32.mrf.mxu0 }
 0x4e5   : > { %995 = vrot.lane.b32.xlu1 %v938_v50, %s1710_s30 }
 0x4e6   : > { %v1356_v52 = vpop.f32.mrf.mxu0 }
 0x4e8   : > { %v941_v53 = vpop.f32.mrf.mxu0 }
 0x4e9   : > { %v892_v54 = vpop.f32.mrf.mxu1 }
 0x4ea   : > { %v1357_v55 = vpop.f32.mrf.mxu0  ;;  %991 = vrot.lane.b32.xlu0 %v892_v54, %s1711_s0 }
 0x4eb   : > { %v1350_v56 = vpop.f32.mrf.mxu1 }
 0x4ed   : > { %v895_v57 = vpop.f32.mrf.mxu1 }
 0x4ef   : > { %v1351_v58 = vpop.f32.mrf.mxu1 }
 0x4f1   : > { %v984_v59 = vpop.f32.mrf.mxu1 }
 0x4f2   : > { %999 = vrot.lane.b32.xlu0 %v984_v59, %s1712_s10 }
 0x4f3   : > { %v1362_v0 = vpop.f32.mrf.mxu1 }
 0x4f5   : > { %v987_v60 = vpop.f32.mrf.mxu1 }
 0x4f7   : > { %v1363_v61 = vpop.f32.mrf.mxu1 }
 0x557   : > { %v996_v1 = vpop.permute.xlu1 %995 }
 0x55c   : > { %v992_v62 = vpop.permute.xlu0 %991 }
 0x55d   : > { %v1002_v63 = vsel %vm558_vm3, %v846_v43, %v992_v62 }
 0x55e   : > { %v1004_v3 = vsel %vm1003_vm6, %v1002_v63, %v996_v1 }
 0x564   : > { %v1000_v2 = vpop.permute.xlu0 %999 }
 0x565   : > { %v1006_v4 = vsel %vm1005_vm7, %v1004_v3, %v1000_v2 }
 0x566   : > { %1373 = vmatmul.mubr.msk.f32.vlgmr.msra.gmra.mxu0 %vm349_vm1, %v1006_v4 }
 0x626   : > { %v1087_v6 = vpop.f32.mrf.mxu0 }
 0x627   : > { %v1088_v7 = vadd.f32 %v1256_v5, %v1087_v6 }
 0x628   : > { %v1374_v8 = vpop.f32.mrf.mxu0 }
 0x629   : > { %1091 = vst.msk [vmem:[%s322_s2] sm:$0xff] %vm349_vm1, %v1088_v7 }
 0x62a   : > { %1614 = shalt.err (!%p1611_p1)
}
 0x62b   : > { %s1615_s8 = scalar_lea.hbm %s2011_s24, 128  ;;  %s1619_s30 = scalar_lea.hbm %s2059_s5, 256 }
 0x62c   : > { %p1616_p2 = scmp.ne.s32.totalorder %s2011_s24, %s1615_s8  ;;  %p1620_p11 = scmp.lt.s32.totalorder %s2011_s24, %s2059_s5 }
 0x62d   : > { %p1621_p0 = scmp.lt.s32.totalorder %s1619_s30, %s1615_s8 }
 0x62e   : > { %p1617_p6 = pnand %p1616_p2, %p1835_p9 }
 0x62f   : > { %p1622_p12 = por %p1621_p0, %p1620_p11 }
 0x630   : > { %p1618_p8 = pneg %p1617_p6 }
 0x632   : > { %p1623_p4 = pnand %p1622_p12, %p1618_p8 }
 0x634   : > { %1626 = shalt.err (!%p1623_p4)
}
 0x635   : > { %1387 = dma.vmem_to_hbm [thread:$0]  (%p1835_p9), %s1108_s28, 128, %s2011_s24, %s1093_s25  }
 0x636 PF: > { %s1119_s11 = sand.u32 1, %s1673_s18   ;;  %p2078_p3 = scmp.ne.s32.totalorder %s2065_s27, 0 }
 0x637   : > { %p2079_p7 = scmp.ge.s32.totalorder %s1693_s23, 2  ;;  %s1120_s1 = scalar_lea.sflag [#allocation6], %s1119_s11 }
 0x639   : > { %p1404_p13 = pnand %p2079_p7, %p2078_p3 }
 0x63b   : > { %p1405_p5 = pneg %p1404_p13 }
 0x63d   : > { %1668 = dma.done.wait (%p1405_p5), %s1120_s1, 128  }
 0x63e   : > { %1670 = vsyncadd (%p1405_p5), %s1120_s1, 4294967168  ;;  %s25_s23 = sadd.s32 1, %s1693_s23   ;;  %s2080_s18 = smov %s1677_s19 }
 0x63f   : > { %p22_p10 = scmp.ge.s32.totalorder %s25_s23, 4   ;;  %s2081_s19 = smov %s1681_s20 }
 0x640   : > { %s2082_s20 = smov %s1844_s9  ;;  %s2083_s21 = smov %s1689_s22 }
 0x641   : > { %s2084_s22 = smov %s2086_s17  ;;  %24 = sbr.rel (!%p22_p10) target bundleno = 13 (0xd), region = 116 }
 0x646   :  { %1125 = vsyncpa [#allocation5], 1 }
 0x647   :  { %1127 = vsyncpa [#allocation5 + $0x1], 1 }
 0x648   :  { %1128 = vsyncpa [#allocation8], 1 }
 0x649   :  { %1130 = vsyncpa [#allocation8 + $0x1], 1 }
 0x64a   :  { %1131 = vsyncpa [#allocation11], 1 }
 0x64b   :  { %1132 = vsyncpa [#allocation6], 1 }
 0x64c   :  { %1134 = vsyncpa [#allocation6 + $0x1], 1 }

// kernel: tpu_custom_call.1
= control target key start
LH: loop header
LB: loop body
LE: loop exit
PB: predicated region body
PF: predicated region fallthrough
CT: control target
= control target key end

     0   :  { %s2054_s0 = inlined_call_operand.hbm [shape: f32[2,8,32], index: 0, kind: input, shape index: {}]   ;;  %s2055_s1 = inlined_call_operand.hbm [shape: f32[2,8,32], index: 1, kind: input, shape index: {}]   ;;  %s2056_s2 = inlined_call_operand.hbm [shape: f32[32,96], index: 2, kind: input, shape index: {}]   ;;  %s2057_s3 = inlined_call_operand.hbm [shape: f32[32,32], index: 3, kind: input, shape index: {}]   ;;  %s2058_s4 = inlined_call_operand.vmem [shape: f32[1,32], index: 4, kind: input, shape index: {}]   ;;  %s2059_s5 = inlined_call_operand.hbm [shape: f32[2,8,32], index: 5, kind: output, shape index: {}]  }
   0x1   :  { %2061 = sst [smem:[#allocation18_spill]] %s2054_s0 }
   0x2   :  { %2062 = sst [smem:[#allocation19_spill]] %s2055_s1 }
   0x3   :  { %2063 = sst [smem:[#allocation20_spill]] %s2056_s2 }
   0x4   :  { %10 = vsyncpa [#allocation5], 0 }
   0x5   :  { %12 = vsyncpa [#allocation5 + $0x1], 0 }
   0x6   :  { %13 = vsyncpa [#allocation8], 0 }
   0x7   :  { %15 = vsyncpa [#allocation8 + $0x1], 0 }
   0x8   :  { %16 = vsyncpa [#allocation11], 0 }
   0x9   :  { %17 = vsyncpa [#allocation6], 0 }
   0xa   :  { %19 = vsyncpa [#allocation6 + $0x1], 0  ;;  %s1744_s18 = smov 0   ;;  %s1746_s19 = smov 0  }
   0xb   :  { %s1748_s20 = smov 0   ;;  %s1750_s21 = smov 0  }
   0xc   :  { %s1752_s22 = smov 0   ;;  %s1754_s23 = smov 0  }
   0xd LB: > { %s1775_s24 = sadd.s32 4294967295, %s1693_s23   ;;  %s1230_s25 = sadd.s32 4294967294, %s1693_s23   ;;  %s1693_s23 = sphi %s1754_s23, %s25_s23   ;;  %s1689_s22 = sphi %s1752_s22, %s2084_s22   ;;  %s1685_s21 = sphi %s1750_s21, %s2083_s21   ;;  %s1681_s20 = sphi %s1748_s20, %s2082_s20   ;;  %s1677_s19 = sphi %s1746_s19, %s2081_s19   ;;  %s1673_s18 = sphi %s1744_s18, %s2080_s18  }
   0xe   : > { %p59_p0 = scmp.ne.s32.totalorder %s1677_s19, %s1673_s18  ;;  %p2060_p1 = scmp.eq.s32.totalorder %s1775_s24, 0 }
   0xf   : > { %p180_p3 = scmp.eq.s32.totalorder %s1230_s25, 1  ;;  %p1231_p5 = scmp.ge.s32.totalorder %s1693_s23, 1 }
  0x10   : > { %p1784_p4 = por %p2060_p1, %p59_p0  ;;  %p187_p7 = scmp.lt.s32.totalorder %s1693_s23, 3 }
  0x11   : > { %p1789_p6 = por %p180_p3, %p59_p0  ;;  %s1695_s29 = smov [#allocation9]  }
  0x12   : > { %p1794_p8 = pnand %p1231_p5, %p187_p7  ;;  %s199_s30 = sshll.u32 %s1695_s29, 4  ;;  %s200_s30 = int_to_ptr.vmem [resolvable:$true] %s199_s30 }
  0x13   : > { %s2065_s27 = scalar_select %p1789_p6, 1, 0 }
  0x14   : > { %p1389_p9 = pneg %p1794_p8  ;;  %s1696_s7 = smov [#allocation10]  }
  0x15   : > { %s212_s8 = sshll.u32 %s1696_s7, 4  ;;  %s1504_s9 = scalar_lea.vmem %s200_s30, 512  ;;  %s213_s8 = int_to_ptr.vmem [resolvable:$true] %s212_s8 }
  0x16   : > { %p1803_p11 = pnand %p1389_p9, %p2060_p1  ;;  %p1505_p13 = scmp.ne.s32.totalorder %s200_s30, %s1504_s9 }
  0x17   : > { %p1512_p5 = scmp.lt.s32.totalorder %s200_s30, %s200_s30  ;;  %p1513_p7 = scmp.lt.s32.totalorder %s1504_s9, %s1504_s9 }
  0x18   : > { %p1495_p12 = pneg %p1803_p11 }
  0x19   : > { %p1514_p10 = por %p1513_p7, %p1512_p5 }
  0x1a   : > { %p1507_p0 = pnand %p1505_p13, %p1495_p12 }
  0x1c   : > { %p1508_p3 = pneg %p1507_p0 }
  0x1e   : > { %p1515_p9 = pnand %p1514_p10, %p1508_p3 }
  0x20   : > { %1518 = shalt.err (!%p1515_p9)
}
  0x21   : > { %s1697_s10 = smov 128   ;;  %s1698_s11 = smov 8  }
  0x22   : > { %s2068_s2 = sld [smem:[#allocation20_spill]]  ;;  %s1530_s14 = scalar_lea.vmem %s213_s8, 512 }
  0x23   : > { %p1531_p1 = scmp.ne.s32.totalorder %s213_s8, %s1530_s14  ;;  %p1538_p2 = scmp.lt.s32.totalorder %s213_s8, %s213_s8 }
  0x24   : > { %p1539_p6 = scmp.lt.s32.totalorder %s1530_s14, %s1530_s14 }
  0x25   : > { %p1533_p13 = pnand %p1531_p1, %p1495_p12 }
  0x26   : > { %p1540_p5 = por %p1539_p6, %p1538_p2 }
  0x27   : > { %p1534_p0 = pneg %p1533_p13 }
  0x28   : > { %1392 = dma.hbm_to_vmem [thread:$0]  (!%p1803_p11), %s2068_s2, 512, %s200_s30, [#allocation8], %s1697_s10, %s1697_s10, %s1698_s11  }
  0x29   : > { %p1541_p10 = pnand %p1540_p5, %p1534_p0 }
  0x2b   : > { %1544 = shalt.err (!%p1541_p10)
}
  0x2c   : > { %1395 = dma.hbm_to_vmem [thread:$0]  (!%p1803_p11), %s2057_s3, 512, %s213_s8, [#allocation11], %s1697_s10, %s1697_s10, %s1698_s11  }
  0x2d   : > { %s37_s17 = sadd.s32 1, %s1689_s22  ;;  %s46_s25 = sadd.s32 1, %s1681_s20 }
  0x2e   : > { %p39_p1 = scmp.ge.s32.totalorder %s37_s17, 2  ;;  %p53_p2 = scmp.ne.s32.totalorder %s1681_s20, %s1677_s19 }
  0x2f   : > { %p54_p6 = scmp.eq.s32.totalorder %s1693_s23, 0  ;;  %p1409_p12 = scmp.lt.s32.totalorder %s1693_s23, 2 }
  0x30   : > { %s2086_s17 = smov (%p39_p1, %s37_s17), 0  ;;  %p2069_p7 = scmp.eq.s32.totalorder %s1775_s24, 1 }
  0x31   : > { %p55_p3 = por %p54_p6, %p53_p2  ;;  %s41_s30 = ssub.s32 %s1689_s22, %s2086_s17 }
  0x32   : > { %p1835_p9 = por %p2069_p7, %p53_p2  ;;  %s229_s6 = sand.u32 1, %s1681_s20  }
  0x33   : > { %p44_p13 = scmp.eq.s32.totalorder %s41_s30, 0  ;;  %s1235_s7 = sshll.u32 %s229_s6, 3 }
  0x34   : > { %s1236_s8 = sshll.u32 %s1689_s22, 7  ;;  %s2071_s0 = sld [smem:[#allocation18_spill]] }
  0x35   : > { %s1844_s9 = scalar_select %p44_p13, %s1681_s20, %s46_s25  }
  0x36   : > { %s233_s13 = scalar_lea.vmem [#allocation4], %s1235_s7  ;;  %p1851_p11 = pnand %p1409_p12, %p55_p3 }
  0x37   : > { %s241_s14 = sshll.u32 %s233_s13, 4  ;;  %s2073_s1 = sld [smem:[#allocation19_spill]]  ;;  %s242_s14 = int_to_ptr.vmem [resolvable:$true] %s241_s14 }
  0x38   : > { %s230_s25 = scalar_lea.sflag [#allocation5], %s229_s6  ;;  %p1547_p0 = pneg %p1851_p11 }
  0x39   : > { %s1558_s10 = scalar_lea.vmem %s242_s14, 128  ;;  %s1699_s11 = smov [#allocation4]  }
  0x3a   : > { %s239_s12 = scalar_lea.hbm %s2071_s0, %s1236_s8  ;;  %p1559_p5 = scmp.ne.s32.totalorder %s242_s14, %s1558_s10 }
  0x3b   : > { %s1563_s13 = sshll.u32 %s1699_s11, 4  ;;  %s1564_s13 = int_to_ptr.vmem [resolvable:$false] %s1563_s13 }
  0x3c   : > { %p1561_p10 = pnand %p1559_p5, %p1547_p0  ;;  %s1565_s0 = scalar_lea.vmem %s1564_s13, 256 }
  0x3d   : > { %s1858_s2 = scalar_lea.hbm %s2073_s1, %s1236_s8  ;;  %p1566_p2 = scmp.lt.s32.totalorder %s242_s14, %s1564_s13 }
  0x3e   : > { %p1562_p1 = pneg %p1561_p10  ;;  %p1567_p6 = scmp.lt.s32.totalorder %s1565_s0, %s1558_s10 }
  0x40   : > { %p1568_p12 = por %p1567_p6, %p1566_p2 }
  0x42   : > { %p1569_p3 = pnand %p1568_p12, %p1562_p1 }
  0x44   : > { %1572 = shalt.err (!%p1569_p3)
}
  0x45   : > { %1399 = dma.hbm_to_vmem [thread:$0]  (!%p1851_p11), %s239_s12, 128, %s242_s14, %s230_s25  }
  0x46   : > { %s248_s6 = sand.u32 1, %s1693_s23   ;;  %s252_s8 = scalar_lea.vmem [#allocation7], %s1235_s7 }
  0x47   : > { %s259_s16 = sshll.u32 %s252_s8, 4  ;;  %s249_s30 = scalar_lea.sflag [#allocation8], %s248_s6  ;;  %s260_s16 = int_to_ptr.vmem [resolvable:$true] %s259_s16 }
  0x48   : > { %s1586_s1 = scalar_lea.vmem %s260_s16, 128  ;;  %s1700_s0 = smov [#allocation7]  }
  0x49   : > { %p1587_p7 = scmp.ne.s32.totalorder %s260_s16, %s1586_s1  ;;  %s1591_s10 = sshll.u32 %s1700_s0, 4  ;;  %s1592_s10 = int_to_ptr.vmem [resolvable:$false] %s1591_s10 }
  0x4a   : > { %s1593_s11 = scalar_lea.vmem %s1592_s10, 256  ;;  %p1594_p10 = scmp.lt.s32.totalorder %s260_s16, %s1592_s10 }
  0x4b   : > { %p1589_p13 = pnand %p1587_p7, %p1547_p0  ;;  %p1595_p1 = scmp.lt.s32.totalorder %s1593_s11, %s1586_s1 }
  0x4d   : > { %p1590_p5 = pneg %p1589_p13  ;;  %p1596_p2 = por %p1595_p1, %p1594_p10 }
  0x4f   : > { %p1597_p6 = pnand %p1596_p2, %p1590_p5 }
  0x51   : > { %1600 = shalt.err (!%p1597_p6)
}
  0x52   : > { %1402 = dma.hbm_to_vmem [thread:$0]  (!%p1851_p11), %s1858_s2, 128, %s260_s16, %s249_s30  }
  0x53   : > { %268 = sbr.rel (%p1794_p8) target bundleno = 1590 (0x636), region = 40  ;;  %s1877_s7 = sand.u32 (!%p1794_p8), 1, %s1677_s19  }
  0x54   : > { %s1880_s12 = sshll.u32 (!%p1794_p8), %s1877_s7, 3  ;;  %s271_s1 = scalar_lea.sflag (!%p1794_p8), [#allocation5], %s1877_s7 }
  0x55   : > { %s274_s14 = scalar_lea.vmem (!%p1794_p8), [#allocation4], %s1880_s12 }
  0x58   : > { %1652 = dma.done.wait (%p1784_p4), %s271_s1, 128  }
  0x59   : > { %1654 = vsyncadd (%p1784_p4), %s271_s1, 4294967168  ;;  %s279_s2 = sand.u32 1, %s1775_s24   ;;  %s283_s15 = scalar_lea.vmem [#allocation7], %s1880_s12 }
  0x5a   : > { %s280_s28 = scalar_lea.sflag [#allocation8], %s279_s2 }
  0x5b   : > { %1656 = dma.done.wait (%p1784_p4), %s280_s28, 128  }
  0x5c   : > { %1658 = vsyncadd (%p1784_p4), %s280_s28, 4294967168  ;;  %p2074_p8 = scmp.eq.s32.totalorder %s1775_s24, 0 }
  0x5e   : > { %1660 = dma.done.wait (%p2074_p8), [#allocation8], 512   ;;  %p2075_p11 = pmov %p2074_p8 }
  0x5f   : > { %p2076_p0 = pmov %p2074_p8 }
  0x60   : > { %1662 = vsyncadd (%p2075_p11), [#allocation8], 4294966784 }
  0x61   : > { %1664 = dma.done.wait (%p2076_p0), [#allocation11], 512   ;;  %p2077_p12 = pmov %p2076_p0 }
  0x62   : > { %v1701_v0 = vmov 0.0   ;;  %vm1702_vm0 = vmmov 0   ;;  %v332_v1 = vld [vmem:[#allocation9 + $0x18] sm:$0xff]  ;;  %v330_v2 = vld [vmem:[#allocation9 + $0x8] sm:$0xff]  ;;  %s1703_s26 = smov 96   ;;  %v331_v3 = vld [vmem:[#allocation9 + $0x10] sm:$0xff]  ;;  %v744_v31 = vlaneseq }
  0x63   : > { %1666 = vsyncadd (%p2077_p12), [#allocation11], 4294966784  ;;  %1294 = vmatprep.subr.mxu0 %v1701_v0  ;;  %1305 = vmatprep.subr.mxu1 %v1701_v0  ;;  %v329_v4 = vld [vmem:[#allocation9] sm:$0xff]  ;;  %vm349_vm1 = vcmask 261120   ;;  %v328_v10 = vld [vmem:[%s283_s15] sm:$0xff]  ;;  %vm424_vm2 = vcmask 60416  }
  0x64   : > { %1302 = vmatprep.mubr.msk.f32.mxu0 %vm1702_vm0, %v1701_v0  ;;  %1313 = vmatprep.mubr.msk.f32.mxu1 %vm1702_vm0, %v1701_v0  ;;  %v463_v5 = vld [vmem:[%s274_s14] sm:$0xff]  ;;  %s1704_s24 = smov 112   ;;  %s1705_s25 = smov 120   ;;  %vm558_vm3 = vcmask 64512   ;;  %v745_v32 = vshrl.u32 %v744_v31, 7  ;;  %v749_v33 = vand.u32 127, %v744_v31 }
  0x65   : > { %343 = vrot.lane.b32.xlu0 %v332_v1, %s1703_s26  ;;  %339 = vrot.lane.b32.xlu1 %v330_v2, %s1703_s26  ;;  %s1706_s13 = smov 104   ;;  %vm808_vm5 = vcmask 1043456   ;;  %s1707_s6 = smov 80   ;;  %vm1003_vm6 = vcmask 130048   ;;  %vm1005_vm7 = vcmask 195584  }
  0x66   : > { %1306 = vmatpush3.msra.mxu1 %v332_v1  ;;  %vm750_vm4 = vcmp.ge.s32.totalorder %v745_v32, %v749_v33  ;;  %s1708_s8 = smov 72   ;;  %s1709_s16 = smov 88  }
  0x67   : > { %1307 = vmatprep.subr.mxu1 %v1701_v0  ;;  %s1710_s30 = smov 16   ;;  %s1711_s0 = smov 8  }
  0x68   : > { %1308 = vmatpush3.msra.mxu1 %v331_v3  ;;  %s1712_s10 = smov 24   ;;  %s1259_s14 = sshll.u32 %s1685_s21, 7 }
  0x69   : > { %341 = vrot.lane.b32.xlu0 %v331_v3, %s1703_s26  ;;  %337 = vrot.lane.b32.xlu1 %v329_v4, %s1703_s26  ;;  %s322_s2 = scalar_lea.vmem [#allocation12], %s1880_s12  ;;  %s1713_s21 = smov [#allocation12]  }
  0x6a   : > { %1309 = vmatprep.subr.mxu1 %v1701_v0  ;;  %s1107_s28 = sshll.u32 %s322_s2, 4  ;;  %s1605_s12 = sshll.u32 %s1713_s21, 4  ;;  %s1108_s28 = int_to_ptr.vmem [resolvable:$true] %s1107_s28  ;;  %s1606_s12 = int_to_ptr.vmem [resolvable:$false] %s1605_s12 }
  0x6b   : > { %1310 = vmatpush3.msra.mxu1 %v330_v2  ;;  %p1608_p13 = scmp.lt.s32.totalorder %s1108_s28, %s1606_s12 }
  0x6c   : > { %1311 = vmatprep.subr.mxu1 %v1701_v0 }
  0x6d   : > { %1312 = vmatpush3.msra.mxu1 %v329_v4 }
  0x6e   : > { %1314 = vmatmul.mubr.msk.f32.vlgmr.msra.gmra.mxu1 %vm349_vm1, %v463_v5  ;;  %1322 = vmatprep.subr.bf16.mxu1 %v1701_v0 }
  0x6f   : > { %1324 = vmatprep.mubr.msk.bf16.mxu1 %vm1702_vm0, %v1701_v0 }
  0xd7   : > { %v344_v6 = vpop.permute.xlu0 %343  ;;  %v340_v7 = vpop.permute.xlu1 %339 }
  0xd8   : > { %1295 = vmatpush3.msra.mxu0 %v344_v6 }
  0xd9   : > { %1296 = vmatprep.subr.mxu0 %v1701_v0 }
  0xdb   : > { %v342_v8 = vpop.permute.xlu0 %341  ;;  %v338_v9 = vpop.permute.xlu1 %337 }
  0xdc   : > { %1297 = vmatpush3.msra.mxu0 %v342_v8 }
  0xdd   : > { %1298 = vmatprep.subr.mxu0 %v1701_v0 }
  0xde   : > { %1299 = vmatpush3.msra.mxu0 %v340_v7 }
  0xdf   : > { %1300 = vmatprep.subr.mxu0 %v1701_v0 }
  0xe0   : > { %1301 = vmatpush3.msra.mxu0 %v338_v9 }
  0xe1   : > { %1303 = vmatmul.mubr.msk.f32.vlgmr.msra.gmra.mxu0 %vm349_vm1, %v328_v10  ;;  %1316 = vmatprep.subr.bf16.mxu0 %v1701_v0 }
  0xe2   : > { %1318 = vmatprep.mubr.msk.bf16.mxu0 %vm1702_vm0, %v1701_v0 }
 0x12e   : > { %v538_v11 = vpop.f32.mrf.mxu1 }
 0x12f   : > { %v542_v16 = vpack.c.bf16 %v538_v11, %v538_v11 }
 0x130   : > { %v1315_v12 = vpop.f32.mrf.mxu1 }
 0x1a1   : > { %v419_v13 = vpop.f32.mrf.mxu0 }
 0x1a2   : > { %v1930_v14 = vpack.c.bf16 %v419_v13, %v419_v13 }
 0x1a3   : > { %v1304_v15 = vpop.f32.mrf.mxu0 }
 0x1a4   : > { %425 = vst.msk [vmem:[#allocation2] sm:$0xf] %vm424_vm2, %v1930_v14  ;;  %443 = vrot.lane.b32.xlu1 %v1930_v14, %s1704_s24  ;;  %433 = vrot.lane.b32.xlu0 %v1930_v14, %s1705_s25 }
 0x1a8   : > { %453 = vrot.lane.b32.xlu0 %v1930_v14, %s1706_s13  ;;  %544 = vrot.lane.b32.xlu1 %v542_v16, %s1705_s25  ;;  %s1093_s25 = scalar_lea.sflag [#allocation6], %s1877_s7 }
 0x1ab   : > { %v550_v17 = vld [vmem:[#allocation2] sm:$0xf] }
 0x1ac   : > { %v563_v18 = vsel %vm558_vm3, %v550_v17, 0  ;;  %548 = vrot.lane.b32.xlu1 %v542_v16, %s1706_s13  ;;  %546 = vrot.lane.b32.xlu0 %v542_v16, %s1704_s24  ;;  %s2011_s24 = scalar_lea.hbm %s2059_s5, %s1259_s14  ;;  %s1601_s13 = scalar_lea.vmem %s1108_s28, 128 }
 0x1ad   : > { %1317 = vmatpush3.bf16.xpose.msra.mxu0 %v563_v18  ;;  %p1602_p4 = scmp.ne.s32.totalorder %s1108_s28, %s1601_s13 }
 0x1ae   : > { %1328 = vmatprep.subr.bf16.mxu0 %v1701_v0 }
 0x1af   : > { %p1603_p3 = pnand %p1602_p4, %p1835_p9 }
 0x1b1   : > { %p1604_p7 = pneg %p1603_p3 }
 0x1b4   : > { %1319 = vmatmul.mubr.msk.bf16.vlgmr.msra.gmra.mxu0 %vm558_vm3, %v542_v16 }
 0x1b5   : > { %1330 = vmatprep.mubr.msk.bf16.mxu0 %vm1702_vm0, %v1701_v0 }
 0x216   : > { %v444_v19 = vpop.permute.xlu1 %443  ;;  %v434_v20 = vpop.permute.xlu0 %433 }
 0x217   : > { %447 = vst.msk [vmem:[#allocation2 + $0x8] sm:$0xf] %vm424_vm2, %v444_v19  ;;  %437 = vst.msk [vmem:[#allocation2 + $0x4] sm:$0xf] %vm424_vm2, %v434_v20 }
 0x21a   : > { %v454_v21 = vpop.permute.xlu0 %453  ;;  %v545_v28 = vpop.permute.xlu1 %544 }
 0x21b   : > { %457 = vst.msk [vmem:[#allocation2 + $0xc] sm:$0xf] %vm424_vm2, %v454_v21 }
 0x21e   : > { %v551_v22 = vld [vmem:[#allocation2 + $0x4] sm:$0xf]  ;;  %v552_v23 = vld [vmem:[#allocation2 + $0x8] sm:$0xf]  ;;  %v547_v26 = vpop.permute.xlu0 %546  ;;  %v549_v30 = vpop.permute.xlu1 %548 }
 0x21f   : > { %v609_v24 = vsel %vm558_vm3, %v551_v22, 0  ;;  %v655_v25 = vsel %vm558_vm3, %v552_v23, 0 }
 0x220   : > { %1323 = vmatpush3.bf16.xpose.msra.mxu1 %v609_v24  ;;  %1329 = vmatpush3.bf16.xpose.msra.mxu0 %v655_v25 }
 0x221   : > { %1334 = vmatprep.subr.bf16.mxu1 %v1701_v0  ;;  %1340 = vmatprep.subr.bf16.mxu0 %v1701_v0 }
 0x222   : > { %v553_v27 = vld [vmem:[#allocation2 + $0xc] sm:$0xf] }
 0x223   : > { %v701_v29 = vsel %vm558_vm3, %v553_v27, 0 }
 0x227   : > { %1325 = vmatmul.mubr.msk.bf16.vlgmr.msra.gmra.mxu1 %vm558_vm3, %v545_v28  ;;  %1331 = vmatmul.mubr.msk.bf16.vlgmr.msra.gmra.mxu0 %vm558_vm3, %v547_v26 }
 0x228   : > { %1335 = vmatpush3.bf16.xpose.msra.mxu1 %v701_v29  ;;  %1336 = vmatprep.mubr.msk.bf16.mxu1 %vm1702_vm0, %v1701_v0 }
 0x229   : > { %1342 = vmatprep.mubr.msk.bf16.mxu0 %vm1702_vm0, %v1701_v0  ;;  %1346 = vmatprep.subr.bf16.mxu1 %v1701_v0 }
 0x22f   : > { %1337 = vmatmul.mubr.msk.bf16.vlgmr.msra.gmra.mxu1 %vm558_vm3, %v549_v30 }
 0x230   : > { %1348 = vmatprep.mubr.msk.bf16.mxu1 %vm1702_vm0, %v1701_v0 }
 0x274   : > { %v599_v34 = vpop.f32.mrf.mxu0 }
 0x275   : > { %v753_v35 = vsel %vm750_vm4, %v599_v34, -inf }
 0x276   : > { %v1320_v36 = vpop.f32.mrf.mxu0  ;;  %v757_v37 = vsel %vm558_vm3, %v753_v35, -inf }
 0x277   : > { %758 = vmax.xlane.f32.xlu0 %v757_v37 }
 0x278   : > { %v602_v38 = vpop.f32.mrf.mxu0 }
 0x27a   : > { %v1321_v39 = vpop.f32.mrf.mxu0 }
 0x2e7   : > { %v645_v40 = vpop.f32.mrf.mxu1  ;;  %v691_v41 = vpop.f32.mrf.mxu0 }
 0x2e8   : > { %v754_v42 = vsel %vm750_vm4, %v645_v40, -inf  ;;  %v755_v43 = vsel %vm750_vm4, %v691_v41, -inf }
 0x2e9   : > { %v1326_v44 = vpop.f32.mrf.mxu1  ;;  %v1332_v45 = vpop.f32.mrf.mxu0  ;;  %v760_v46 = vsel %vm558_vm3, %v754_v42, -inf  ;;  %v763_v47 = vsel %vm558_vm3, %v755_v43, -inf }
 0x2ea   : > { %761 = vmax.xlane.f32.xlu1 %v760_v46  ;;  %764 = vmax.xlane.f32.xlu0 %v763_v47  ;;  %v1010_v47 = vld [vmem:[#allocation10 + $0x18] sm:$0xff] }
 0x2eb   : > { %v648_v48 = vpop.f32.mrf.mxu1  ;;  %v694_v49 = vpop.f32.mrf.mxu0 }
 0x2ec   : > { %v1009_v48 = vld [vmem:[#allocation10 + $0x10] sm:$0xff]  ;;  %v1008_v49 = vld [vmem:[#allocation10 + $0x8] sm:$0xff] }
 0x2ed   : > { %v1327_v50 = vpop.f32.mrf.mxu1  ;;  %v1333_v51 = vpop.f32.mrf.mxu0 }
 0x2ee   : > { %v1007_v51 = vld [vmem:[#allocation10] sm:$0xff] }
 0x2ef   : > { %v737_v52 = vpop.f32.mrf.mxu1 }
 0x2f0   : > { %v756_v53 = vsel %vm750_vm4, %v737_v52, -inf }
 0x2f1   : > { %v1338_v54 = vpop.f32.mrf.mxu1  ;;  %v766_v55 = vsel %vm558_vm3, %v756_v53, -inf }
 0x2f2   : > { %767 = vmax.xlane.f32.xlu0 %v766_v55 }
 0x2f3   : > { %v740_v56 = vpop.f32.mrf.mxu1 }
 0x2f5   : > { %v1339_v57 = vpop.f32.mrf.mxu1 }
 0x2fb   : > { %429 = vrot.lane.b32.xlu1 %v1930_v14, %s1703_s26 }
 0x300   : > { %v759_v58 = vpop.xlane.xlu0 %758 }
 0x301   : > { %v769_v59 = vsub.f32 %v753_v35, %v759_v58 }
 0x303   : > { %v773_v60 = vmul.f32 1.442695, %v769_v59 }
 0x305   : > { %1477 = vpow2.f32 %v773_v60 }
 0x312   : > { %v1478_v61 = vpop.eup %1477 }
 0x313   : > { %v781_v62 = vsel %vm558_vm3, %v1478_v61, 0.0 }
 0x31f   : > { %782 = vadd.xlane.f32.xlu1 %v781_v62 }
 0x373   : > { %v762_v63 = vpop.xlane.xlu1 %761  ;;  %v765_v1 = vpop.xlane.xlu0 %764 }
 0x374   : > { %v770_v2 = vsub.f32 %v754_v42, %v762_v63  ;;  %v771_v3 = vsub.f32 %v755_v43, %v765_v1 }
 0x376   : > { %v775_v4 = vmul.f32 1.442695, %v770_v2  ;;  %v777_v5 = vmul.f32 1.442695, %v771_v3 }
 0x377   : > { %v430_v6 = vpop.permute.xlu1 %429 }
 0x378   : > { %1479 = vpow2.f32 %v775_v4  ;;  %432 = vst.msk [vmem:[#allocation3] sm:$0xf] %vm424_vm2, %v430_v6 }
 0x379   : > { %1481 = vpow2.f32 %v777_v5  ;;  %v1256_v5 = vld [vmem:[%s2058_s4] ss:$0 sm:$0xff] }
 0x37b   : > { %v768_v7 = vpop.xlane.xlu0 %767 }
 0x37c   : > { %v772_v8 = vsub.f32 %v756_v53, %v768_v7 }
 0x37e   : > { %v779_v9 = vmul.f32 1.442695, %v772_v8 }
 0x37f   : > { %v554_v10 = vld [vmem:[#allocation3] sm:$0xf] }
 0x380   : > { %1483 = vpow2.f32 %v779_v9  ;;  %v810_v11 = vsel %vm808_vm5, %v554_v10, 0 }
 0x381   : > { %1341 = vmatpush3.bf16.msra.mxu0 %v810_v11 }
 0x382   : > { %1352 = vmatprep.subr.bf16.mxu0 %v1701_v0 }
 0x385   : > { %v1480_v12 = vpop.eup %1479 }
 0x386   : > { %v1482_v13 = vpop.eup %1481  ;;  %v784_v15 = vsel %vm558_vm3, %v1480_v12, 0.0 }
 0x387   : > { %785 = vadd.xlane.f32.xlu0 %v784_v15  ;;  %v787_v16 = vsel %vm558_vm3, %v1482_v13, 0.0 }
 0x388   : > { %788 = vadd.xlane.f32.xlu1 %v787_v16 }
 0x38d   : > { %v1484_v17 = vpop.eup %1483 }
 0x38e   : > { %v790_v18 = vsel %vm558_vm3, %v1484_v17, 0.0 }
 0x38f   : > { %791 = vadd.xlane.f32.xlu0 %v790_v18 }
 0x399   : > { %448 = vrot.lane.b32.xlu1 %v1930_v14, %s1707_s6  ;;  %s1607_s6 = scalar_lea.vmem %s1606_s12, 256 }
 0x39a   : > { %p1609_p5 = scmp.lt.s32.totalorder %s1607_s6, %s1601_s13 }
 0x39c   : > { %p1610_p10 = por %p1609_p5, %p1608_p13 }
 0x39d   : > { %458 = vrot.lane.b32.xlu1 %v1930_v14, %s1708_s8 }
 0x39e   : > { %p1611_p1 = pnand %p1610_p10, %p1604_p7 }
 0x3a5   : > { %438 = vrot.lane.b32.xlu0 %v1930_v14, %s1709_s16 }
 0x3a8   : > { %v783_v19 = vpop.xlane.xlu1 %782 }
 0x3a9   : > { %1485 = vrcp.f32 %v783_v19 }
 0x3b6   : > { %v1486_v20 = vpop.eup %1485 }
 0x3b7   : > { %v794_v21 = vmul.f32 %v1486_v20, %v1478_v61 }
 0x3b9   : > { %v801_v22 = vpack.c.bf16 %v794_v21, %v794_v21 }
 0x3bb   : > { %1343 = vmatmul.mubr.msk.bf16.vlgmr.msra.gmra.mxu0 %vm558_vm3, %v801_v22 }
 0x3bc   : > { %1354 = vmatprep.mubr.msk.bf16.mxu0 %vm1702_vm0, %v1701_v0 }
 0x410   : > { %v786_v23 = vpop.xlane.xlu0 %785 }
 0x411   : > { %v789_v24 = vpop.xlane.xlu1 %788 }
 0x412   : > { %1487 = vrcp.f32 %v789_v24 }
 0x413   : > { %1489 = vrcp.f32 %v786_v23 }
 0x415   : > { %v449_v25 = vpop.permute.xlu1 %448 }
 0x416   : > { %452 = vst.msk [vmem:[#allocation3 + $0x8] sm:$0xf] %vm424_vm2, %v449_v25 }
 0x418   : > { %v792_v26 = vpop.xlane.xlu0 %791 }
 0x419   : > { %v459_v27 = vpop.permute.xlu1 %458  ;;  %1491 = vrcp.f32 %v792_v26 }
 0x41a   : > { %462 = vst.msk [vmem:[#allocation3 + $0xc] sm:$0xf] %vm424_vm2, %v459_v27 }
 0x41c   : > { %v439_v14 = vpop.permute.xlu0 %438 }
 0x41d   : > { %442 = vst.msk [vmem:[#allocation3 + $0x4] sm:$0xf] %vm424_vm2, %v439_v14  ;;  %v556_v28 = vld [vmem:[#allocation3 + $0x8] sm:$0xf] }
 0x41e   : > { %v902_v29 = vsel %vm808_vm5, %v556_v28, 0 }
 0x41f   : > { %v1488_v30 = vpop.eup %1487  ;;  %1353 = vmatpush3.bf16.msra.mxu0 %v902_v29 }
 0x420   : > { %v1490_v31 = vpop.eup %1489  ;;  %v798_v32 = vmul.f32 %v1488_v30, %v1482_v13  ;;  %1364 = vmatprep.subr.mxu0 %v1701_v0 }
 0x421   : > { %v796_v34 = vmul.f32 %v1490_v31, %v1480_v12  ;;  %v557_v37 = vld [vmem:[#allocation3 + $0xc] sm:$0xf] }
 0x422   : > { %v803_v33 = vpack.c.bf16 %v798_v32, %v798_v32  ;;  %v948_v40 = vsel %vm808_vm5, %v557_v37, 0 }
 0x423   : > { %v802_v38 = vpack.c.bf16 %v796_v34, %v796_v34 }
 0x424   : > { %1355 = vmatmul.mubr.msk.bf16.vlgmr.msra.gmra.mxu0 %vm558_vm3, %v803_v33  ;;  %v555_v35 = vld [vmem:[#allocation3 + $0x4] sm:$0xf] }
 0x425   : > { %v856_v36 = vsel %vm808_vm5, %v555_v35, 0  ;;  %1372 = vmatprep.mubr.msk.f32.mxu0 %vm1702_vm0, %v1701_v0  ;;  %1365 = vmatpush3.msra.mxu0 %v1010_v47 }
 0x426   : > { %1347 = vmatpush3.bf16.msra.mxu1 %v856_v36  ;;  %v1492_v39 = vpop.eup %1491  ;;  %1366 = vmatprep.subr.mxu0 %v1701_v0 }
 0x427   : > { %1358 = vmatprep.subr.bf16.mxu1 %v1701_v0  ;;  %v800_v41 = vmul.f32 %v1492_v39, %v1484_v17  ;;  %1367 = vmatpush3.msra.mxu0 %v1009_v48 }
 0x428   : > { %1368 = vmatprep.subr.mxu0 %v1701_v0 }
 0x429   : > { %1349 = vmatmul.mubr.msk.bf16.vlgmr.msra.gmra.mxu1 %vm558_vm3, %v802_v38  ;;  %v804_v42 = vpack.c.bf16 %v800_v41, %v800_v41  ;;  %1369 = vmatpush3.msra.mxu0 %v1008_v49 }
 0x42a   : > { %1359 = vmatpush3.bf16.msra.mxu1 %v948_v40  ;;  %1360 = vmatprep.mubr.msk.bf16.mxu1 %vm1702_vm0, %v1701_v0 }
 0x42b   : > { %1370 = vmatprep.subr.mxu0 %v1701_v0 }
 0x42c   : > { %1371 = vmatpush3.msra.mxu0 %v1007_v51 }
 0x431   : > { %1361 = vmatmul.mubr.msk.bf16.vlgmr.msra.gmra.mxu1 %vm558_vm3, %v804_v42 }
 0x47b   : > { %v846_v43 = vpop.f32.mrf.mxu0 }
 0x47d   : > { %v1344_v44 = vpop.f32.mrf.mxu0 }
 0x47f   : > { %v849_v45 = vpop.f32.mrf.mxu0 }
 0x481   : > { %v1345_v46 = vpop.f32.mrf.mxu0 }
 0x4e4   : > { %v938_v50 = vpop.f32.mrf.mxu0 }
 0x4e5   : > { %995 = vrot.lane.b32.xlu1 %v938_v50, %s1710_s30 }
 0x4e6   : > { %v1356_v52 = vpop.f32.mrf.mxu0 }
 0x4e8   : > { %v941_v53 = vpop.f32.mrf.mxu0 }
 0x4e9   : > { %v892_v54 = vpop.f32.mrf.mxu1 }
 0x4ea   : > { %v1357_v55 = vpop.f32.mrf.mxu0  ;;  %991 = vrot.lane.b32.xlu0 %v892_v54, %s1711_s0 }
 0x4eb   : > { %v1350_v56 = vpop.f32.mrf.mxu1 }
 0x4ed   : > { %v895_v57 = vpop.f32.mrf.mxu1 }
 0x4ef   : > { %v1351_v58 = vpop.f32.mrf.mxu1 }
 0x4f1   : > { %v984_v59 = vpop.f32.mrf.mxu1 }
 0x4f2   : > { %999 = vrot.lane.b32.xlu0 %v984_v59, %s1712_s10 }
 0x4f3   : > { %v1362_v0 = vpop.f32.mrf.mxu1 }
 0x4f5   : > { %v987_v60 = vpop.f32.mrf.mxu1 }
 0x4f7   : > { %v1363_v61 = vpop.f32.mrf.mxu1 }
 0x557   : > { %v996_v1 = vpop.permute.xlu1 %995 }
 0x55c   : > { %v992_v62 = vpop.permute.xlu0 %991 }
 0x55d   : > { %v1002_v63 = vsel %vm558_vm3, %v846_v43, %v992_v62 }
 0x55e   : > { %v1004_v3 = vsel %vm1003_vm6, %v1002_v63, %v996_v1 }
 0x564   : > { %v1000_v2 = vpop.permute.xlu0 %999 }
 0x565   : > { %v1006_v4 = vsel %vm1005_vm7, %v1004_v3, %v1000_v2 }
 0x566   : > { %1373 = vmatmul.mubr.msk.f32.vlgmr.msra.gmra.mxu0 %vm349_vm1, %v1006_v4 }
 0x626   : > { %v1087_v6 = vpop.f32.mrf.mxu0 }
 0x627   : > { %v1088_v7 = vadd.f32 %v1256_v5, %v1087_v6 }
 0x628   : > { %v1374_v8 = vpop.f32.mrf.mxu0 }
 0x629   : > { %1091 = vst.msk [vmem:[%s322_s2] sm:$0xff] %vm349_vm1, %v1088_v7 }
 0x62a   : > { %1614 = shalt.err (!%p1611_p1)
}
 0x62b   : > { %s1615_s8 = scalar_lea.hbm %s2011_s24, 128  ;;  %s1619_s30 = scalar_lea.hbm %s2059_s5, 256 }
 0x62c   : > { %p1616_p2 = scmp.ne.s32.totalorder %s2011_s24, %s1615_s8  ;;  %p1620_p11 = scmp.lt.s32.totalorder %s2011_s24, %s2059_s5 }
 0x62d   : > { %p1621_p0 = scmp.lt.s32.totalorder %s1619_s30, %s1615_s8 }
 0x62e   : > { %p1617_p6 = pnand %p1616_p2, %p1835_p9 }
 0x62f   : > { %p1622_p12 = por %p1621_p0, %p1620_p11 }
 0x630   : > { %p1618_p8 = pneg %p1617_p6 }
 0x632   : > { %p1623_p4 = pnand %p1622_p12, %p1618_p8 }
 0x634   : > { %1626 = shalt.err (!%p1623_p4)
}
 0x635   : > { %1387 = dma.vmem_to_hbm [thread:$0]  (%p1835_p9), %s1108_s28, 128, %s2011_s24, %s1093_s25  }
 0x636 PF: > { %s1119_s11 = sand.u32 1, %s1673_s18   ;;  %p2078_p3 = scmp.ne.s32.totalorder %s2065_s27, 0 }
 0x637   : > { %p2079_p7 = scmp.ge.s32.totalorder %s1693_s23, 2  ;;  %s1120_s1 = scalar_lea.sflag [#allocation6], %s1119_s11 }
 0x639   : > { %p1404_p13 = pnand %p2079_p7, %p2078_p3 }
 0x63b   : > { %p1405_p5 = pneg %p1404_p13 }
 0x63d   : > { %1668 = dma.done.wait (%p1405_p5), %s1120_s1, 128  }
 0x63e   : > { %1670 = vsyncadd (%p1405_p5), %s1120_s1, 4294967168  ;;  %s25_s23 = sadd.s32 1, %s1693_s23   ;;  %s2080_s18 = smov %s1677_s19 }
 0x63f   : > { %p22_p10 = scmp.ge.s32.totalorder %s25_s23, 4   ;;  %s2081_s19 = smov %s1681_s20 }
 0x640   : > { %s2082_s20 = smov %s1844_s9  ;;  %s2083_s21 = smov %s1689_s22 }
 0x641   : > { %s2084_s22 = smov %s2086_s17  ;;  %24 = sbr.rel (!%p22_p10) target bundleno = 13 (0xd), region = 116 }
 0x646   :  { %1125 = vsyncpa [#allocation5], 1 }
 0x647   :  { %1127 = vsyncpa [#allocation5 + $0x1], 1 }
 0x648   :  { %1128 = vsyncpa [#allocation8], 1 }
 0x649   :  { %1130 = vsyncpa [#allocation8 + $0x1], 1 }
 0x64a   :  { %1131 = vsyncpa [#allocation11], 1 }
 0x64b   :  { %1132 = vsyncpa [#allocation6], 1 }
 0x64c   :  { %1134 = vsyncpa [#allocation6 + $0x1], 1 }

</bundles_post_ra>
